<compile_context>
chip_gen: v5e
topology: v5e:2x2
jax: 0.10.0
libtpu: 0.0.40
codegen_flags: <defaults>
</compile_context>

<pallas_src>
import functools

import jax
import jax.numpy as jnp
from jax import lax
from jax.experimental import pallas as pl
from jax.experimental.pallas import tpu as pltpu


def _gv_kernel(out_ref, tgt_ref, pct_ref, res_ref, *, patch_size):
    _, _, H, W = out_ref.shape
    p = patch_size
    Hp, Wp = H // p, W // p
    k = p * p
    f32 = jnp.float32

    col = lax.broadcasted_iota(jnp.int32, (H, W), 1)
    row = lax.broadcasted_iota(jnp.int32, (H, W), 0)

    def nbr_col(x, s):
        # y[i, j] = x[i, j + s], zero outside [0, W)   (s in {-1, +1})
        r = pltpu.roll(x, (-s) % W, axis=1)
        if s > 0:
            return jnp.where(col >= W - s, 0.0, r)
        return jnp.where(col < -s, 0.0, r)

    def nbr_row(x, s):
        # y[i, j] = x[i + s, j], zero outside [0, H)
        r = pltpu.roll(x, (-s) % H, axis=0)
        if s > 0:
            return jnp.where(row >= H - s, 0.0, r)
        return jnp.where(row < -s, 0.0, r)

    def grad_x(g):
        # cross-correlation with [[-1,0,1],[-2,0,2],[-1,0,1]], padding=1
        h = nbr_col(g, 1) - nbr_col(g, -1)
        return nbr_row(h, -1) + 2.0 * h + nbr_row(h, 1)

    def grad_y(g):
        # cross-correlation with [[1,2,1],[0,0,0],[-1,-2,-1]], padding=1
        h = nbr_col(g, -1) + 2.0 * g + nbr_col(g, 1)
        return nbr_row(h, -1) - nbr_row(h, 1)

    pct = pct_ref[...]                        # (W, Wp) 0/1 lane-pooling matrix
    hp = lax.Precision.HIGHEST                # keep pooled sums f32-exact
    inv_k = 1.0 / float(k)
    inv_km1 = 1.0 / float(k - 1)

    def patch_var(g):
        # Unbiased variance over each non-overlapping p x p patch
        # (matches Unfold(stride=p) + torch.var(dim=1, unbiased)).
        rs = jnp.sum(g.reshape(Hp, p, W), axis=1)          # VPU row pooling
        rq = jnp.sum((g * g).reshape(Hp, p, W), axis=1)
        s = jnp.dot(rs, pct, precision=hp, preferred_element_type=f32)
        sq = jnp.dot(rq, pct, precision=hp, preferred_element_type=f32)
        return (sq - s * s * inv_k) * inv_km1               # (Hp, Wp)

    def gray(ref):
        return (0.2989 * ref[0, 0].astype(f32)
                + 0.587 * ref[0, 1].astype(f32)
                + 0.114 * ref[0, 2].astype(f32))

    go, gt = gray(out_ref), gray(tgt_ref)

    dvx = patch_var(grad_x(gt)) - patch_var(grad_x(go))
    dvy = patch_var(grad_y(gt)) - patch_var(grad_y(go))

    d = dvx * dvx + dvy * dvy                               # (Hp, Wp)
    res_ref[...] = jnp.sum(d[None], keepdims=True)          # (1, 1, 1)


def gradient_variance_loss(output, target, patch_size):
    """JAX/Pallas equivalent of GradientVariance(patch_size).forward(output, target)."""
    N, C, H, W = output.shape
    assert C == 3, "GV loss expects RGB (N, 3, H, W) inputs"
    assert H % patch_size == 0 and W % patch_size == 0
    p = patch_size
    Hp, Wp = H // p, W // p
    f32 = jnp.float32

    # 0/1 lane-pooling matrix for the in-patch column reduction (tiny).
    pct = (jnp.arange(W)[:, None] // p
           == jnp.arange(Wp)[None, :]).astype(f32)          # (W, Wp)

    # VMEM: two double-buffered (1, 3, H, W) input blocks + small extras.
    itemsize = output.dtype.itemsize
    vmem_need = 2 * 2 * 3 * H * W * itemsize + (4 << 20)
    vmem_limit = int(min(max(vmem_need, 32 << 20), 64 << 20))

    partial = pl.pallas_call(
        functools.partial(_gv_kernel, patch_size=p),
        out_shape=jax.ShapeDtypeStruct((N, 1, 1), f32),
        grid=(N,),
        in_specs=[
            pl.BlockSpec((1, 3, H, W), lambda n: (n, 0, 0, 0)),
            pl.BlockSpec((1, 3, H, W), lambda n: (n, 0, 0, 0)),
            pl.BlockSpec((W, Wp), lambda n: (0, 0)),
        ],
        out_specs=pl.BlockSpec((1, 1, 1), lambda n: (n, 0, 0)),
        compiler_params=pltpu.CompilerParams(
            dimension_semantics=("parallel",),
            vmem_limit_bytes=vmem_limit),
    )(output, target, pct)

    # MSE means over N * num_patches for x and y gradients, summed.
    return jnp.sum(partial) / jnp.float32(N * Hp * Wp)


def reference_loss(output, target, p):
    """Pure-JAX reference matching the PyTorch module semantics."""
    def to_gray(x):
        return 0.2989 * x[:, 0] + 0.587 * x[:, 1] + 0.114 * x[:, 2]

    kx = jnp.array([[-1., 0., 1.], [-2., 0., 2.], [-1., 0., 1.]], jnp.float32)
    ky = jnp.array([[1., 2., 1.], [0., 0., 0.], [-1., -2., -1.]], jnp.float32)

    def conv3(g, kern):
        N, H, W = g.shape
        gp = jnp.pad(g, ((0, 0), (1, 1), (1, 1)))
        out = jnp.zeros_like(g)
        for di in range(3):
            for dj in range(3):
                out = out + kern[di, dj] * gp[:, di:di + H, dj:dj + W]
        return out

    def patch_var(g):
        N, H, W = g.shape
        x = g.reshape(N, H // p, p, W // p, p)
        x = x.transpose(0, 1, 3, 2, 4).reshape(N, (H // p) * (W // p), p * p)
        return jnp.var(x, axis=-1, ddof=1)

    go, gt = to_gray(output), to_gray(target)
    gxo, gyo = conv3(go, kx), conv3(go, ky)
    gxt, gyt = conv3(gt, kx), conv3(gt, ky)
    lx = jnp.mean((patch_var(gxt) - patch_var(gxo)) ** 2)
    ly = jnp.mean((patch_var(gyt) - patch_var(gyo)) ** 2)
    return lx + ly


if __name__ == "__main__":
    key = jax.random.PRNGKey(0)
    k1, k2 = jax.random.split(key)
    output = jax.random.uniform(k1, (2, 3, 16, 16), dtype=jnp.float32)
    target = jax.random.uniform(k2, (2, 3, 16, 16), dtype=jnp.float32)
    patch_size = 8

    loss = gradient_variance_loss(output, target, patch_size)
    loss = jax.block_until_ready(loss)

    ref = reference_loss(output, target, patch_size)
    assert jnp.allclose(loss, ref, rtol=1e-3, atol=1e-5), (loss, ref)
    print("KERNEL_OK")
</pallas_src>

<mosaic_0001>
module attributes {stable_mosaic.version = 11 : i64} {
  func.func @_gv_kernel(%arg0: i32, %arg1: memref<1x3x16x16xf32, #tpu.memory_space<vmem>>, %arg2: memref<1x3x16x16xf32, #tpu.memory_space<vmem>>, %arg3: memref<16x2xf32, #tpu.memory_space<vmem>>, %arg4: memref<1x1x1xf32, #tpu.memory_space<vmem>>) attributes {dimension_semantics = [#tpu.dimension_semantics<parallel>], iteration_bounds = array<i64: 2>, scalar_prefetch = 0 : i64, scratch_operands = 0 : i64, tpu.core_type = #tpu.core_type<tc>, window_params = [{transform_indices = @transform_0, window_bounds = array<i64: 1, 3, 16, 16>}, {transform_indices = @transform_1, window_bounds = array<i64: 1, 3, 16, 16>}, {pipeline_mode = #tpu.pipeline_mode<synchronous>, transform_indices = @transform_2, window_bounds = array<i64: 16, 2>}, {transform_indices = @transform_3, window_bounds = array<i64: 1, 1, 1>}]} {
    %0 = tpu.iota {dimensions = array<i32: 1>} : vector<16x16xi32>
    %1 = tpu.iota {dimensions = array<i32: 0>} : vector<16x16xi32>
    %c0 = arith.constant 0 : index
    %c0_0 = arith.constant 0 : index
    %2 = vector.load %arg3[%c0, %c0_0] : memref<16x2xf32, #tpu.memory_space<vmem>>, vector<16x2xf32>
    %c0_1 = arith.constant 0 : index
    %c0_2 = arith.constant 0 : index
    %c0_3 = arith.constant 0 : index
    %c0_4 = arith.constant 0 : index
    %3 = vector.load %arg1[%c0_1, %c0_2, %c0_3, %c0_4] : memref<1x3x16x16xf32, #tpu.memory_space<vmem>>, vector<1x1x16x16xf32>
    %4 = vector.shape_cast %3 : vector<1x1x16x16xf32> to vector<16x16xf32>
    %cst = arith.constant 2.989000e-01 : f32
    %5 = vector.broadcast %cst : f32 to vector<16x16xf32>
    %6 = arith.mulf %5, %4 : vector<16x16xf32>
    %c0_5 = arith.constant 0 : index
    %c1 = arith.constant 1 : index
    %c0_6 = arith.constant 0 : index
    %c0_7 = arith.constant 0 : index
    %7 = vector.load %arg1[%c0_5, %c1, %c0_6, %c0_7] : memref<1x3x16x16xf32, #tpu.memory_space<vmem>>, vector<1x1x16x16xf32>
    %8 = vector.shape_cast %7 : vector<1x1x16x16xf32> to vector<16x16xf32>
    %cst_8 = arith.constant 5.870000e-01 : f32
    %9 = vector.broadcast %cst_8 : f32 to vector<16x16xf32>
    %10 = arith.mulf %9, %8 : vector<16x16xf32>
    %11 = arith.addf %6, %10 : vector<16x16xf32>
    %c0_9 = arith.constant 0 : index
    %c2 = arith.constant 2 : index
    %c0_10 = arith.constant 0 : index
    %c0_11 = arith.constant 0 : index
    %12 = vector.load %arg1[%c0_9, %c2, %c0_10, %c0_11] : memref<1x3x16x16xf32, #tpu.memory_space<vmem>>, vector<1x1x16x16xf32>
    %13 = vector.shape_cast %12 : vector<1x1x16x16xf32> to vector<16x16xf32>
    %cst_12 = arith.constant 1.140000e-01 : f32
    %14 = vector.broadcast %cst_12 : f32 to vector<16x16xf32>
    %15 = arith.mulf %14, %13 : vector<16x16xf32>
    %16 = arith.addf %11, %15 : vector<16x16xf32>
    %c0_13 = arith.constant 0 : index
    %c0_14 = arith.constant 0 : index
    %c0_15 = arith.constant 0 : index
    %c0_16 = arith.constant 0 : index
    %17 = vector.load %arg2[%c0_13, %c0_14, %c0_15, %c0_16] : memref<1x3x16x16xf32, #tpu.memory_space<vmem>>, vector<1x1x16x16xf32>
    %18 = vector.shape_cast %17 : vector<1x1x16x16xf32> to vector<16x16xf32>
    %cst_17 = arith.constant 2.989000e-01 : f32
    %19 = vector.broadcast %cst_17 : f32 to vector<16x16xf32>
    %20 = arith.mulf %19, %18 : vector<16x16xf32>
    %c0_18 = arith.constant 0 : index
    %c1_19 = arith.constant 1 : index
    %c0_20 = arith.constant 0 : index
    %c0_21 = arith.constant 0 : index
    %21 = vector.load %arg2[%c0_18, %c1_19, %c0_20, %c0_21] : memref<1x3x16x16xf32, #tpu.memory_space<vmem>>, vector<1x1x16x16xf32>
    %22 = vector.shape_cast %21 : vector<1x1x16x16xf32> to vector<16x16xf32>
    %cst_22 = arith.constant 5.870000e-01 : f32
    %23 = vector.broadcast %cst_22 : f32 to vector<16x16xf32>
    %24 = arith.mulf %23, %22 : vector<16x16xf32>
    %25 = arith.addf %20, %24 : vector<16x16xf32>
    %c0_23 = arith.constant 0 : index
    %c2_24 = arith.constant 2 : index
    %c0_25 = arith.constant 0 : index
    %c0_26 = arith.constant 0 : index
    %26 = vector.load %arg2[%c0_23, %c2_24, %c0_25, %c0_26] : memref<1x3x16x16xf32, #tpu.memory_space<vmem>>, vector<1x1x16x16xf32>
    %27 = vector.shape_cast %26 : vector<1x1x16x16xf32> to vector<16x16xf32>
    %cst_27 = arith.constant 1.140000e-01 : f32
    %28 = vector.broadcast %cst_27 : f32 to vector<16x16xf32>
    %29 = arith.mulf %28, %27 : vector<16x16xf32>
    %30 = arith.addf %25, %29 : vector<16x16xf32>
    %c15_i32 = arith.constant 15 : i32
    %31 = tpu.dynamic_rotate %30 by %c15_i32 dim 1 : vector<16x16xf32>, i32 -> vector<16x16xf32>
    %c15_i32_28 = arith.constant 15 : i32
    %32 = vector.broadcast %c15_i32_28 : i32 to vector<16x16xi32>
    %33 = arith.cmpi sge, %0, %32 : vector<16x16xi32>
    %cst_29 = arith.constant 0.000000e+00 : f32
    %34 = vector.broadcast %cst_29 : f32 to vector<16x16xf32>
    %35 = arith.select %33, %34, %31 : vector<16x16xi1>, vector<16x16xf32>
    %c1_i32 = arith.constant 1 : i32
    %36 = tpu.dynamic_rotate %30 by %c1_i32 dim 1 : vector<16x16xf32>, i32 -> vector<16x16xf32>
    %c1_i32_30 = arith.constant 1 : i32
    %37 = vector.broadcast %c1_i32_30 : i32 to vector<16x16xi32>
    %38 = arith.cmpi slt, %0, %37 : vector<16x16xi32>
    %cst_31 = arith.constant 0.000000e+00 : f32
    %39 = vector.broadcast %cst_31 : f32 to vector<16x16xf32>
    %40 = arith.select %38, %39, %36 : vector<16x16xi1>, vector<16x16xf32>
    %41 = arith.subf %35, %40 : vector<16x16xf32>
    %c1_i32_32 = arith.constant 1 : i32
    %42 = tpu.dynamic_rotate %41 by %c1_i32_32 dim 0 : vector<16x16xf32>, i32 -> vector<16x16xf32>
    %c1_i32_33 = arith.constant 1 : i32
    %43 = vector.broadcast %c1_i32_33 : i32 to vector<16x16xi32>
    %44 = arith.cmpi slt, %1, %43 : vector<16x16xi32>
    %cst_34 = arith.constant 0.000000e+00 : f32
    %45 = vector.broadcast %cst_34 : f32 to vector<16x16xf32>
    %46 = arith.select %44, %45, %42 : vector<16x16xi1>, vector<16x16xf32>
    %cst_35 = arith.constant 2.000000e+00 : f32
    %47 = vector.broadcast %cst_35 : f32 to vector<16x16xf32>
    %48 = arith.mulf %47, %41 : vector<16x16xf32>
    %49 = arith.addf %46, %48 : vector<16x16xf32>
    %c15_i32_36 = arith.constant 15 : i32
    %50 = tpu.dynamic_rotate %41 by %c15_i32_36 dim 0 : vector<16x16xf32>, i32 -> vector<16x16xf32>
    %c15_i32_37 = arith.constant 15 : i32
    %51 = vector.broadcast %c15_i32_37 : i32 to vector<16x16xi32>
    %52 = arith.cmpi sge, %1, %51 : vector<16x16xi32>
    %cst_38 = arith.constant 0.000000e+00 : f32
    %53 = vector.broadcast %cst_38 : f32 to vector<16x16xf32>
    %54 = arith.select %52, %53, %50 : vector<16x16xi1>, vector<16x16xf32>
    %55 = arith.addf %49, %54 : vector<16x16xf32>
    %56 = vector.shape_cast %55 : vector<16x16xf32> to vector<2x8x16xf32>
    %cst_39 = arith.constant dense<0.000000e+00> : vector<2x16xf32>
    %57 = vector.multi_reduction <add>, %56, %cst_39 [1] : vector<2x8x16xf32> to vector<2x16xf32>
    %58 = arith.mulf %55, %55 : vector<16x16xf32>
    %59 = vector.shape_cast %58 : vector<16x16xf32> to vector<2x8x16xf32>
    %cst_40 = arith.constant dense<0.000000e+00> : vector<2x16xf32>
    %60 = vector.multi_reduction <add>, %59, %cst_40 [1] : vector<2x8x16xf32> to vector<2x16xf32>
    %cst_41 = arith.constant dense<0.000000e+00> : vector<2x2xf32>
    %61 = tpu.matmul %57, %2, %cst_41 {dimension_numbers = #tpu.dot_dimension_numbers<[1], [0], [0], [1], [0, 0, 1, 1], [], []>, precision = #tpu.contract_precision<fp32>} : vector<2x16xf32>, vector<16x2xf32>, vector<2x2xf32> -> vector<2x2xf32>
    %cst_42 = arith.constant dense<0.000000e+00> : vector<2x2xf32>
    %62 = tpu.matmul %60, %2, %cst_42 {dimension_numbers = #tpu.dot_dimension_numbers<[1], [0], [0], [1], [0, 0, 1, 1], [], []>, precision = #tpu.contract_precision<fp32>} : vector<2x16xf32>, vector<16x2xf32>, vector<2x2xf32> -> vector<2x2xf32>
    %63 = arith.mulf %61, %61 : vector<2x2xf32>
    %cst_43 = arith.constant 1.562500e-02 : f32
    %64 = vector.broadcast %cst_43 : f32 to vector<2x2xf32>
    %65 = arith.mulf %63, %64 : vector<2x2xf32>
    %66 = arith.subf %62, %65 : vector<2x2xf32>
    %cst_44 = arith.constant 0.0158730168 : f32
    %67 = vector.broadcast %cst_44 : f32 to vector<2x2xf32>
    %68 = arith.mulf %66, %67 : vector<2x2xf32>
    %c15_i32_45 = arith.constant 15 : i32
    %69 = tpu.dynamic_rotate %16 by %c15_i32_45 dim 1 : vector<16x16xf32>, i32 -> vector<16x16xf32>
    %c15_i32_46 = arith.constant 15 : i32
    %70 = vector.broadcast %c15_i32_46 : i32 to vector<16x16xi32>
    %71 = arith.cmpi sge, %0, %70 : vector<16x16xi32>
    %cst_47 = arith.constant 0.000000e+00 : f32
    %72 = vector.broadcast %cst_47 : f32 to vector<16x16xf32>
    %73 = arith.select %71, %72, %69 : vector<16x16xi1>, vector<16x16xf32>
    %c1_i32_48 = arith.constant 1 : i32
    %74 = tpu.dynamic_rotate %16 by %c1_i32_48 dim 1 : vector<16x16xf32>, i32 -> vector<16x16xf32>
    %c1_i32_49 = arith.constant 1 : i32
    %75 = vector.broadcast %c1_i32_49 : i32 to vector<16x16xi32>
    %76 = arith.cmpi slt, %0, %75 : vector<16x16xi32>
    %cst_50 = arith.constant 0.000000e+00 : f32
    %77 = vector.broadcast %cst_50 : f32 to vector<16x16xf32>
    %78 = arith.select %76, %77, %74 : vector<16x16xi1>, vector<16x16xf32>
    %79 = arith.subf %73, %78 : vector<16x16xf32>
    %c1_i32_51 = arith.constant 1 : i32
    %80 = tpu.dynamic_rotate %79 by %c1_i32_51 dim 0 : vector<16x16xf32>, i32 -> vector<16x16xf32>
    %c1_i32_52 = arith.constant 1 : i32
    %81 = vector.broadcast %c1_i32_52 : i32 to vector<16x16xi32>
    %82 = arith.cmpi slt, %1, %81 : vector<16x16xi32>
    %cst_53 = arith.constant 0.000000e+00 : f32
    %83 = vector.broadcast %cst_53 : f32 to vector<16x16xf32>
    %84 = arith.select %82, %83, %80 : vector<16x16xi1>, vector<16x16xf32>
    %cst_54 = arith.constant 2.000000e+00 : f32
    %85 = vector.broadcast %cst_54 : f32 to vector<16x16xf32>
    %86 = arith.mulf %85, %79 : vector<16x16xf32>
    %87 = arith.addf %84, %86 : vector<16x16xf32>
    %c15_i32_55 = arith.constant 15 : i32
    %88 = tpu.dynamic_rotate %79 by %c15_i32_55 dim 0 : vector<16x16xf32>, i32 -> vector<16x16xf32>
    %c15_i32_56 = arith.constant 15 : i32
    %89 = vector.broadcast %c15_i32_56 : i32 to vector<16x16xi32>
    %90 = arith.cmpi sge, %1, %89 : vector<16x16xi32>
    %cst_57 = arith.constant 0.000000e+00 : f32
    %91 = vector.broadcast %cst_57 : f32 to vector<16x16xf32>
    %92 = arith.select %90, %91, %88 : vector<16x16xi1>, vector<16x16xf32>
    %93 = arith.addf %87, %92 : vector<16x16xf32>
    %94 = vector.shape_cast %93 : vector<16x16xf32> to vector<2x8x16xf32>
    %cst_58 = arith.constant dense<0.000000e+00> : vector<2x16xf32>
    %95 = vector.multi_reduction <add>, %94, %cst_58 [1] : vector<2x8x16xf32> to vector<2x16xf32>
    %96 = arith.mulf %93, %93 : vector<16x16xf32>
    %97 = vector.shape_cast %96 : vector<16x16xf32> to vector<2x8x16xf32>
    %cst_59 = arith.constant dense<0.000000e+00> : vector<2x16xf32>
    %98 = vector.multi_reduction <add>, %97, %cst_59 [1] : vector<2x8x16xf32> to vector<2x16xf32>
    %cst_60 = arith.constant dense<0.000000e+00> : vector<2x2xf32>
    %99 = tpu.matmul %95, %2, %cst_60 {dimension_numbers = #tpu.dot_dimension_numbers<[1], [0], [0], [1], [0, 0, 1, 1], [], []>, precision = #tpu.contract_precision<fp32>} : vector<2x16xf32>, vector<16x2xf32>, vector<2x2xf32> -> vector<2x2xf32>
    %cst_61 = arith.constant dense<0.000000e+00> : vector<2x2xf32>
    %100 = tpu.matmul %98, %2, %cst_61 {dimension_numbers = #tpu.dot_dimension_numbers<[1], [0], [0], [1], [0, 0, 1, 1], [], []>, precision = #tpu.contract_precision<fp32>} : vector<2x16xf32>, vector<16x2xf32>, vector<2x2xf32> -> vector<2x2xf32>
    %101 = arith.mulf %99, %99 : vector<2x2xf32>
    %cst_62 = arith.constant 1.562500e-02 : f32
    %102 = vector.broadcast %cst_62 : f32 to vector<2x2xf32>
    %103 = arith.mulf %101, %102 : vector<2x2xf32>
    %104 = arith.subf %100, %103 : vector<2x2xf32>
    %cst_63 = arith.constant 0.0158730168 : f32
    %105 = vector.broadcast %cst_63 : f32 to vector<2x2xf32>
    %106 = arith.mulf %104, %105 : vector<2x2xf32>
    %107 = arith.subf %68, %106 : vector<2x2xf32>
    %c1_i32_64 = arith.constant 1 : i32
    %108 = tpu.dynamic_rotate %30 by %c1_i32_64 dim 1 : vector<16x16xf32>, i32 -> vector<16x16xf32>
    %c1_i32_65 = arith.constant 1 : i32
    %109 = vector.broadcast %c1_i32_65 : i32 to vector<16x16xi32>
    %110 = arith.cmpi slt, %0, %109 : vector<16x16xi32>
    %cst_66 = arith.constant 0.000000e+00 : f32
    %111 = vector.broadcast %cst_66 : f32 to vector<16x16xf32>
    %112 = arith.select %110, %111, %108 : vector<16x16xi1>, vector<16x16xf32>
    %cst_67 = arith.constant 2.000000e+00 : f32
    %113 = vector.broadcast %cst_67 : f32 to vector<16x16xf32>
    %114 = arith.mulf %113, %30 : vector<16x16xf32>
    %115 = arith.addf %112, %114 : vector<16x16xf32>
    %c15_i32_68 = arith.constant 15 : i32
    %116 = tpu.dynamic_rotate %30 by %c15_i32_68 dim 1 : vector<16x16xf32>, i32 -> vector<16x16xf32>
    %c15_i32_69 = arith.constant 15 : i32
    %117 = vector.broadcast %c15_i32_69 : i32 to vector<16x16xi32>
    %118 = arith.cmpi sge, %0, %117 : vector<16x16xi32>
    %cst_70 = arith.constant 0.000000e+00 : f32
    %119 = vector.broadcast %cst_70 : f32 to vector<16x16xf32>
    %120 = arith.select %118, %119, %116 : vector<16x16xi1>, vector<16x16xf32>
    %121 = arith.addf %115, %120 : vector<16x16xf32>
    %c1_i32_71 = arith.constant 1 : i32
    %122 = tpu.dynamic_rotate %121 by %c1_i32_71 dim 0 : vector<16x16xf32>, i32 -> vector<16x16xf32>
    %c1_i32_72 = arith.constant 1 : i32
    %123 = vector.broadcast %c1_i32_72 : i32 to vector<16x16xi32>
    %124 = arith.cmpi slt, %1, %123 : vector<16x16xi32>
    %cst_73 = arith.constant 0.000000e+00 : f32
    %125 = vector.broadcast %cst_73 : f32 to vector<16x16xf32>
    %126 = arith.select %124, %125, %122 : vector<16x16xi1>, vector<16x16xf32>
    %c15_i32_74 = arith.constant 15 : i32
    %127 = tpu.dynamic_rotate %121 by %c15_i32_74 dim 0 : vector<16x16xf32>, i32 -> vector<16x16xf32>
    %c15_i32_75 = arith.constant 15 : i32
    %128 = vector.broadcast %c15_i32_75 : i32 to vector<16x16xi32>
    %129 = arith.cmpi sge, %1, %128 : vector<16x16xi32>
    %cst_76 = arith.constant 0.000000e+00 : f32
    %130 = vector.broadcast %cst_76 : f32 to vector<16x16xf32>
    %131 = arith.select %129, %130, %127 : vector<16x16xi1>, vector<16x16xf32>
    %132 = arith.subf %126, %131 : vector<16x16xf32>
    %133 = vector.shape_cast %132 : vector<16x16xf32> to vector<2x8x16xf32>
    %cst_77 = arith.constant dense<0.000000e+00> : vector<2x16xf32>
    %134 = vector.multi_reduction <add>, %133, %cst_77 [1] : vector<2x8x16xf32> to vector<2x16xf32>
    %135 = arith.mulf %132, %132 : vector<16x16xf32>
    %136 = vector.shape_cast %135 : vector<16x16xf32> to vector<2x8x16xf32>
    %cst_78 = arith.constant dense<0.000000e+00> : vector<2x16xf32>
    %137 = vector.multi_reduction <add>, %136, %cst_78 [1] : vector<2x8x16xf32> to vector<2x16xf32>
    %cst_79 = arith.constant dense<0.000000e+00> : vector<2x2xf32>
    %138 = tpu.matmul %134, %2, %cst_79 {dimension_numbers = #tpu.dot_dimension_numbers<[1], [0], [0], [1], [0, 0, 1, 1], [], []>, precision = #tpu.contract_precision<fp32>} : vector<2x16xf32>, vector<16x2xf32>, vector<2x2xf32> -> vector<2x2xf32>
    %cst_80 = arith.constant dense<0.000000e+00> : vector<2x2xf32>
    %139 = tpu.matmul %137, %2, %cst_80 {dimension_numbers = #tpu.dot_dimension_numbers<[1], [0], [0], [1], [0, 0, 1, 1], [], []>, precision = #tpu.contract_precision<fp32>} : vector<2x16xf32>, vector<16x2xf32>, vector<2x2xf32> -> vector<2x2xf32>
    %140 = arith.mulf %138, %138 : vector<2x2xf32>
    %cst_81 = arith.constant 1.562500e-02 : f32
    %141 = vector.broadcast %cst_81 : f32 to vector<2x2xf32>
    %142 = arith.mulf %140, %141 : vector<2x2xf32>
    %143 = arith.subf %139, %142 : vector<2x2xf32>
    %cst_82 = arith.constant 0.0158730168 : f32
    %144 = vector.broadcast %cst_82 : f32 to vector<2x2xf32>
    %145 = arith.mulf %143, %144 : vector<2x2xf32>
    %c1_i32_83 = arith.constant 1 : i32
    %146 = tpu.dynamic_rotate %16 by %c1_i32_83 dim 1 : vector<16x16xf32>, i32 -> vector<16x16xf32>
    %c1_i32_84 = arith.constant 1 : i32
    %147 = vector.broadcast %c1_i32_84 : i32 to vector<16x16xi32>
    %148 = arith.cmpi slt, %0, %147 : vector<16x16xi32>
    %cst_85 = arith.constant 0.000000e+00 : f32
    %149 = vector.broadcast %cst_85 : f32 to vector<16x16xf32>
    %150 = arith.select %148, %149, %146 : vector<16x16xi1>, vector<16x16xf32>
    %cst_86 = arith.constant 2.000000e+00 : f32
    %151 = vector.broadcast %cst_86 : f32 to vector<16x16xf32>
    %152 = arith.mulf %151, %16 : vector<16x16xf32>
    %153 = arith.addf %150, %152 : vector<16x16xf32>
    %c15_i32_87 = arith.constant 15 : i32
    %154 = tpu.dynamic_rotate %16 by %c15_i32_87 dim 1 : vector<16x16xf32>, i32 -> vector<16x16xf32>
    %c15_i32_88 = arith.constant 15 : i32
    %155 = vector.broadcast %c15_i32_88 : i32 to vector<16x16xi32>
    %156 = arith.cmpi sge, %0, %155 : vector<16x16xi32>
    %cst_89 = arith.constant 0.000000e+00 : f32
    %157 = vector.broadcast %cst_89 : f32 to vector<16x16xf32>
    %158 = arith.select %156, %157, %154 : vector<16x16xi1>, vector<16x16xf32>
    %159 = arith.addf %153, %158 : vector<16x16xf32>
    %c1_i32_90 = arith.constant 1 : i32
    %160 = tpu.dynamic_rotate %159 by %c1_i32_90 dim 0 : vector<16x16xf32>, i32 -> vector<16x16xf32>
    %c1_i32_91 = arith.constant 1 : i32
    %161 = vector.broadcast %c1_i32_91 : i32 to vector<16x16xi32>
    %162 = arith.cmpi slt, %1, %161 : vector<16x16xi32>
    %cst_92 = arith.constant 0.000000e+00 : f32
    %163 = vector.broadcast %cst_92 : f32 to vector<16x16xf32>
    %164 = arith.select %162, %163, %160 : vector<16x16xi1>, vector<16x16xf32>
    %c15_i32_93 = arith.constant 15 : i32
    %165 = tpu.dynamic_rotate %159 by %c15_i32_93 dim 0 : vector<16x16xf32>, i32 -> vector<16x16xf32>
    %c15_i32_94 = arith.constant 15 : i32
    %166 = vector.broadcast %c15_i32_94 : i32 to vector<16x16xi32>
    %167 = arith.cmpi sge, %1, %166 : vector<16x16xi32>
    %cst_95 = arith.constant 0.000000e+00 : f32
    %168 = vector.broadcast %cst_95 : f32 to vector<16x16xf32>
    %169 = arith.select %167, %168, %165 : vector<16x16xi1>, vector<16x16xf32>
    %170 = arith.subf %164, %169 : vector<16x16xf32>
    %171 = vector.shape_cast %170 : vector<16x16xf32> to vector<2x8x16xf32>
    %cst_96 = arith.constant dense<0.000000e+00> : vector<2x16xf32>
    %172 = vector.multi_reduction <add>, %171, %cst_96 [1] : vector<2x8x16xf32> to vector<2x16xf32>
    %173 = arith.mulf %170, %170 : vector<16x16xf32>
    %174 = vector.shape_cast %173 : vector<16x16xf32> to vector<2x8x16xf32>
    %cst_97 = arith.constant dense<0.000000e+00> : vector<2x16xf32>
    %175 = vector.multi_reduction <add>, %174, %cst_97 [1] : vector<2x8x16xf32> to vector<2x16xf32>
    %cst_98 = arith.constant dense<0.000000e+00> : vector<2x2xf32>
    %176 = tpu.matmul %172, %2, %cst_98 {dimension_numbers = #tpu.dot_dimension_numbers<[1], [0], [0], [1], [0, 0, 1, 1], [], []>, precision = #tpu.contract_precision<fp32>} : vector<2x16xf32>, vector<16x2xf32>, vector<2x2xf32> -> vector<2x2xf32>
    %cst_99 = arith.constant dense<0.000000e+00> : vector<2x2xf32>
    %177 = tpu.matmul %175, %2, %cst_99 {dimension_numbers = #tpu.dot_dimension_numbers<[1], [0], [0], [1], [0, 0, 1, 1], [], []>, precision = #tpu.contract_precision<fp32>} : vector<2x16xf32>, vector<16x2xf32>, vector<2x2xf32> -> vector<2x2xf32>
    %178 = arith.mulf %176, %176 : vector<2x2xf32>
    %cst_100 = arith.constant 1.562500e-02 : f32
    %179 = vector.broadcast %cst_100 : f32 to vector<2x2xf32>
    %180 = arith.mulf %178, %179 : vector<2x2xf32>
    %181 = arith.subf %177, %180 : vector<2x2xf32>
    %cst_101 = arith.constant 0.0158730168 : f32
    %182 = vector.broadcast %cst_101 : f32 to vector<2x2xf32>
    %183 = arith.mulf %181, %182 : vector<2x2xf32>
    %184 = arith.subf %145, %183 : vector<2x2xf32>
    %185 = arith.mulf %107, %107 : vector<2x2xf32>
    %186 = arith.mulf %184, %184 : vector<2x2xf32>
    %187 = arith.addf %185, %186 : vector<2x2xf32>
    %188 = vector.shape_cast %187 : vector<2x2xf32> to vector<1x2x2xf32>
    %189 = vector.shape_cast %188 : vector<1x2x2xf32> to vector<1x1x2x2xf32>
    %cst_102 = arith.constant dense<0.000000e+00> : vector<1xf32>
    %190 = vector.multi_reduction <add>, %189, %cst_102 [1, 2, 3] : vector<1x1x2x2xf32> to vector<1xf32>
    %191 = vector.shape_cast %190 : vector<1xf32> to vector<1x1x1x1xf32>
    %192 = vector.extract %191[0, 0, 0, 0] : f32 from vector<1x1x1x1xf32>
    %193 = vector.broadcast %192 : f32 to vector<1x1x1xf32>
    %c0_103 = arith.constant 0 : index
    %c0_104 = arith.constant 0 : index
    %c0_105 = arith.constant 0 : index
    %194 = vector.load %arg4[%c0_103, %c0_104, %c0_105] : memref<1x1x1xf32, #tpu.memory_space<vmem>>, vector<1x1x1xf32>
    tpu.vector_store %arg4[%c0_103, %c0_104, %c0_105], %193 {strides = array<i32>} : memref<1x1x1xf32, #tpu.memory_space<vmem>>, vector<1x1x1xf32>,
    return
  }
  func.func @transform_0(%arg0: i32) -> (i32, i32, i32, i32) {
    %c0_i32 = arith.constant 0 : i32
    %c0_i32_0 = arith.constant 0 : i32
    %c0_i32_1 = arith.constant 0 : i32
    %c0_i32_2 = arith.constant 0 : i32
    return %arg0, %c0_i32, %c0_i32_0, %c0_i32_1 : i32, i32, i32, i32
  }
  func.func @transform_1(%arg0: i32) -> (i32, i32, i32, i32) {
    %c0_i32 = arith.constant 0 : i32
    %c0_i32_0 = arith.constant 0 : i32
    %c0_i32_1 = arith.constant 0 : i32
    %c0_i32_2 = arith.constant 0 : i32
    return %arg0, %c0_i32, %c0_i32_0, %c0_i32_1 : i32, i32, i32, i32
  }
  func.func @transform_2(%arg0: i32) -> (i32, i32) {
    %c0_i32 = arith.constant 0 : i32
    %c0_i32_0 = arith.constant 0 : i32
    %c0_i32_1 = arith.constant 0 : i32
    return %c0_i32, %c0_i32_0 : i32, i32
  }
  func.func @transform_3(%arg0: i32) -> (i32, i32, i32) {
    %c0_i32 = arith.constant 0 : i32
    %c0_i32_0 = arith.constant 0 : i32
    %c0_i32_1 = arith.constant 0 : i32
    return %arg0, %c0_i32, %c0_i32_0 : i32, i32, i32
  }
}

</mosaic_0001>

<bundles_post_ra>
// kernel: tpu_custom_call.1
= control target key start
LH: loop header
LB: loop body
LE: loop exit
PB: predicated region body
PF: predicated region fallthrough
CT: control target
= control target key end

     0   :  { %8 = vsyncpa [#allocation3], 0  ;;  %s2641_s0 = inlined_call_operand.hbm [shape: f32[2,3,16,16], index: 0, kind: input, shape index: {}]   ;;  %s2642_s1 = inlined_call_operand.hbm [shape: f32[2,3,16,16], index: 1, kind: input, shape index: {}]   ;;  %s2643_s2 = inlined_call_operand.vmem [shape: f32[16,2], index: 2, kind: input, shape index: {}]   ;;  %s2644_s3 = inlined_call_operand.vmem [shape: f32[2,1,1], index: 3, kind: output, shape index: {}]  }
   0x1   :  { %10 = vsyncpa [#allocation3 + $0x1], 0 }
   0x2   :  { %11 = vsyncpa [#allocation5], 0 }
   0x3   :  { %13 = vsyncpa [#allocation5 + $0x1], 0  ;;  %s2170_s12 = smov 0   ;;  %s2172_s13 = smov 0  }
   0x4   :  { %s2174_s14 = smov 0   ;;  %s2176_s15 = smov 0  }
   0x5 LB: > { %s2189_s16 = sadd.s32 4294967295, %s2143_s15   ;;  %s2192_s17 = sadd.s32 1, %s2143_s15   ;;  %s2143_s15 = sphi %s2176_s15, %s2651_s15   ;;  %s2139_s14 = sphi %s2174_s14, %s2650_s14   ;;  %s2135_s13 = sphi %s2172_s13, %s2649_s13   ;;  %s2131_s12 = sphi %s2170_s12, %s2648_s12  }
   0x6   : > { %s23_s18 = ssub.s32 %s2143_s15, %s2192_s17  ;;  %s26_s19 = sadd.s32 1, %s2139_s14 }
   0x7   : > { %p24_p0 = scmp.eq.s32.totalorder %s23_s18, 0  ;;  %p33_p1 = scmp.ne.s32.totalorder %s2139_s14, %s2135_s13 }
   0x8   : > { %p34_p2 = scmp.eq.s32.totalorder %s2143_s15, 0  ;;  %p39_p3 = scmp.ne.s32.totalorder %s2135_s13, %s2131_s12 }
   0x9   : > { %s2202_s20 = scalar_select %p24_p0, %s2139_s14, %s26_s19  }
   0xa   : > { %p35_p4 = por %p34_p2, %p33_p1  ;;  %p40_p5 = scmp.eq.s32.totalorder %s2189_s16, 0 }
   0xb   : > { %p2007_p6 = scmp.lt.s32.totalorder %s2143_s15, 2  ;;  %s2211_s22 = sand.u32 1, %s2139_s14  }
   0xc   : > { %p2206_p7 = por %p40_p5, %p39_p3  ;;  %s1989_s23 = smul.u32 48, %s2211_s22 }
   0xd   : > { %s1990_s24 = smul.u32 48, %s2143_s15  ;;  %p2215_p8 = pnand %p2007_p6, %p35_p4 }
   0xe   : > { %s143_s29 = scalar_lea.vmem [#allocation2], %s1989_s23  ;;  %p1978_p9 = scmp.ge.s32.totalorder %s2143_s15, 1 }
   0xf   : > { %s148_s28 = scalar_lea.hbm %s2641_s0, %s1990_s24  ;;  %s151_s30 = sshll.u32 %s143_s29, 4  ;;  %s152_s30 = int_to_ptr.vmem [resolvable:$true] %s151_s30 }
  0x10   : > { %s149_s4 = sshll.u32 %s148_s28, 4  ;;  %s140_s5 = scalar_lea.sflag [#allocation3], %s2211_s22  ;;  %s150_s4 = int_to_ptr.hbm [resolvable:$true] %s149_s4 }
  0x11   : > { %s2045_s6 = sshra.s32 %s150_s4, 4  ;;  %p2049_p11 = pneg %p2215_p8  ;;  %s2046_s6 = int_to_ptr.hbm [resolvable:$true] %s2045_s6 }
  0x12   : > { %s2047_s7 = scalar_lea.hbm %s2046_s6, 48  ;;  %s2052_s10 = scalar_lea.hbm %s2641_s0, 96 }
  0x13   : > { %p2048_p10 = scmp.ne.s32.totalorder %s2046_s6, %s2047_s7  ;;  %p2053_p0 = scmp.lt.s32.totalorder %s2046_s6, %s2641_s0 }
  0x14   : > { %p2054_p1 = scmp.lt.s32.totalorder %s2052_s10, %s2047_s7 }
  0x15   : > { %p2050_p12 = pnand %p2049_p11, %p2048_p10 }
  0x16   : > { %p2055_p2 = por %p2054_p1, %p2053_p0 }
  0x17   : > { %p2051_p13 = pneg %p2050_p12 }
  0x19   : > { %p2056_p3 = pnand %p2055_p2, %p2051_p13 }
  0x1b   : > { %2059 = shalt.err (!%p2056_p3)
}
  0x1c   : > { %s2145_s18 = smov 128   ;;  %s2146_s19 = smov 8  }
  0x1d   : > { %2003 = dma.hbm_to_vmem [thread:$0]  (!%p2215_p8), %s150_s4, 768, %s152_s30, %s140_s5, %s2145_s18, %s2145_s18, %s2146_s19  }
  0x1e   : > { %p181_p4 = scmp.lt.s32.totalorder %s2143_s15, 3  ;;  %s170_s28 = scalar_lea.hbm %s2642_s1, %s1990_s24 }
  0x1f   : > { %s171_s6 = sshll.u32 %s170_s28, 4  ;;  %s165_s7 = scalar_lea.vmem [#allocation4], %s1989_s23  ;;  %s172_s6 = int_to_ptr.hbm [resolvable:$true] %s171_s6 }
  0x20   : > { %p2249_p5 = pnand %p1978_p9, %p181_p4  ;;  %s173_s8 = sshll.u32 %s165_s7, 4  ;;  %s174_s8 = int_to_ptr.vmem [resolvable:$true] %s173_s8 }
  0x21   : > { %s162_s9 = scalar_lea.sflag [#allocation5], %s2211_s22  ;;  %s2075_s10 = sshra.s32 %s172_s6, 4  ;;  %s2076_s10 = int_to_ptr.hbm [resolvable:$true] %s2075_s10 }
  0x22   : > { %s2077_s30 = scalar_lea.hbm %s2076_s10, 48  ;;  %s2082_s4 = scalar_lea.hbm %s2642_s1, 96 }
  0x23   : > { %p2078_p6 = scmp.ne.s32.totalorder %s2076_s10, %s2077_s30  ;;  %p2083_p9 = scmp.lt.s32.totalorder %s2076_s10, %s2642_s1 }
  0x24   : > { %p2084_p13 = scmp.lt.s32.totalorder %s2082_s4, %s2077_s30 }
  0x25   : > { %p2080_p10 = pnand %p2078_p6, %p2049_p11 }
  0x26   : > { %p2085_p0 = por %p2084_p13, %p2083_p9 }
  0x27   : > { %p2081_p12 = pneg %p2080_p10 }
  0x29   : > { %p2086_p1 = pnand %p2085_p0, %p2081_p12 }
  0x2b   : > { %2089 = shalt.err (!%p2086_p1)
}
  0x2c   : > { %2006 = dma.hbm_to_vmem [thread:$0]  (!%p2215_p8), %s172_s6, 768, %s174_s8, %s162_s9, %s2145_s18, %s2145_s18, %s2146_s19  }
  0x2d   : > { %185 = sbr.rel (%p2249_p5) target bundleno = 855 (0x357), region = 32  ;;  %s187_s22 = sand.u32 (!%p2249_p5), 1, %s2135_s13  }
  0x2e   : > { %s1993_s23 = smul.u32 (!%p2249_p5), 48, %s187_s22  ;;  %s188_s12 = scalar_lea.sflag (!%p2249_p5), [#allocation3], %s187_s22 }
  0x30   : > { %s2270_s26 = scalar_lea.vmem (!%p2249_p5), [#allocation2], %s1993_s23 }
  0x32   : > { %2122 = dma.done.wait (%p2206_p7), %s188_s12, 768  }
  0x33   : > { %2124 = vsyncadd (%p2206_p7), %s188_s12, 4294966528  ;;  %s198_s27 = scalar_lea.sflag [#allocation5], %s187_s22  ;;  %s201_s28 = scalar_lea.vmem [#allocation4], %s1993_s23 }
  0x34   : > { %2126 = dma.done.wait (%p2206_p7), %s198_s27, 768  }
  0x35   : > { %2128 = vsyncadd (%p2206_p7), %s198_s27, 4294966528  ;;  %v256_v0 = vld [vmem:[%s201_s28] sm:$0xff]  ;;  %v1983_v1 = vld [vmem:[%s201_s28 + $0x10] sm:$0xff]  ;;  %s2147_s21 = smov 16   ;;  %vm274_vm0 = vcmask 1047680   ;;  %s2148_s25 = smov 127   ;;  %v231_v48 = vlaneseq }
  0x36   : > { %v1985_v2 = vld [vmem:[%s201_s28 + $0x20] sm:$0xff]  ;;  %v258_v3 = vmul.f32 0.2989, %v256_v0  ;;  %v263_v4 = vmul.f32 0.587, %v1983_v1  ;;  %v1979_v7 = vld [vmem:[%s2270_s26 + $0x10] sm:$0xff] }
  0x37   : > { %v270_v5 = vmul.f32 0.114, %v1985_v2  ;;  %v238_v6 = vld [vmem:[%s2270_s26] sm:$0xff]  ;;  %v245_v11 = vmul.f32 0.587, %v1979_v7  ;;  %v257_v13 = vld [vmem:[%s201_s28 + $0x8] sm:$0xff] }
  0x38   : > { %v1981_v8 = vld [vmem:[%s2270_s26 + $0x20] sm:$0xff]  ;;  %v265_v9 = vadd.f32 %v263_v4, %v258_v3  ;;  %v240_v10 = vmul.f32 0.2989, %v238_v6  ;;  %v1984_v14 = vld [vmem:[%s201_s28 + $0x18] sm:$0xff]  ;;  %v1986_v15 = vld [vmem:[%s201_s28 + $0x28] sm:$0xff]  ;;  %s2149_s18 = smov 113  }
  0x39   : > { %v252_v12 = vmul.f32 0.114, %v1981_v8  ;;  %v259_v18 = vmul.f32 0.2989, %v257_v13  ;;  %v264_v19 = vmul.f32 0.587, %v1984_v14 }
  0x3a   : > { %v2283_v16 = vadd.f32 %v270_v5, %v265_v9  ;;  %v247_v17 = vadd.f32 %v245_v11, %v240_v10  ;;  %v239_v20 = vld [vmem:[%s2270_s26 + $0x8] sm:$0xff]  ;;  %v1980_v21 = vld [vmem:[%s2270_s26 + $0x18] sm:$0xff]  ;;  %v271_v26 = vmul.f32 0.114, %v1986_v15  ;;  %v2312_v51 = vand.u32 127, %v231_v48  ;;  %v236_v53 = vld [vmem:[%s2643_s2] sm:$0xff] }
  0x3b   : > { %v241_v22 = vmul.f32 0.2989, %v239_v20  ;;  %v246_v23 = vmul.f32 0.587, %v1980_v21  ;;  %v266_v25 = vadd.f32 %v264_v19, %v259_v18  ;;  %v1982_v27 = vld [vmem:[%s2270_s26 + $0x28] sm:$0xff]  ;;  %v2322_v56 = vand.u32 4294901760, %v236_v53 }
  0x3c   : > { %275 = vrot.lane.b32.xlu0 %v2283_v16, %s2147_s21  ;;  %v2288_v24 = vadd.f32 %v252_v12, %v247_v17  ;;  %v253_v29 = vmul.f32 0.114, %v1982_v27  ;;  %v237_v50 = vld [vmem:[%s2643_s2 + $0x8] sm:$0xff]  ;;  %v2326_v57 = vshrl.u32 %v231_v48, 7  ;;  %vm287_vm1 = vcmp.ge.s32.totalorder %v2312_v51, 15  ;;  %p228_p7 = scmp.lt.s32.totalorder %s2189_s16, 1 }
  0x3d   : > { %v248_v28 = vadd.f32 %v246_v23, %v241_v22  ;;  %v273_v30 = vadd.f32 %v271_v26, %v266_v25  ;;  %v2314_v52 = vand.u32 4294901760, %v237_v50  ;;  %vm298_vm2 = vcmp.lt.s32.totalorder %v2312_v51, 1 }
  0x3e   : > { %696 = vrot.lane.b32.xlu1 %v2288_v24, %s2147_s21  ;;  %v2334_v59 = vsub.f32 %v236_v53, %v2322_v56  ;;  %v1109_v2 = vmul.f32 2.0, %v2283_v16  ;;  %v2353_v4 = vadd.s32 8, %v2326_v57  ;;  %vm311_vm3 = vcmp.lt.s32.totalorder %v2326_v57, 1  ;;  %s2653_s16 = smov (!%p228_p7, %s2189_s16), 1 }
  0x3f   : > { %v2292_v31 = vadd.f32 %v253_v29, %v248_v28  ;;  %v2320_v55 = vsub.f32 %v237_v50, %v2314_v52  ;;  %468 = vmatpush.msra.mxu3 %v2314_v52  ;;  %384 = vmatpush.msra.mxu0 %v2314_v52  ;;  %v1110_v1 = vmul.f32 2.0, %v273_v30  ;;  %vm323_vm4 = vcmp.lt.s32.totalorder %v2326_v57, 7  ;;  %s230_s10 = scalar_lea.vmem %s2644_s3, %s2653_s16 }
  0x40   : > { %v2344_v63 = vand.u32 4294901760, %v2334_v59  ;;  %vm327_vm5 = vcmp.ge.s32.totalorder %v2353_v4, 15  ;;  %vm332_vm6 = vcmask 130048   ;;  %vm365_vm7 = vcmask 1041409  }
  0x41   : > { %v2331_v58 = vand.u32 4294901760, %v2320_v55  ;;  %443 = vmatpush.msra.mxu2 %v2320_v55  ;;  %470 = vmatpush.msra.mxu3 %v2322_v56  ;;  %vm1877_vm8 = vcmask 9216   ;;  %vm1889_vm9 = vcmask 0  }
  0x42   : > { %386 = vmatpush.msra.mxu0 %v2322_v56  ;;  %v419_v6 = vsub.f32 %v2334_v59, %v2344_v63 }
  0x43   : > { %v413_v62 = vsub.f32 %v2320_v55, %v2331_v58  ;;  %446 = vmatpush.msra.mxu2 %v2334_v59 }
  0x44   : > { %278 = vrot.lane.b32.xlu0 %v273_v30, %s2147_s21  ;;  %495 = vmatpush.msrb.mxu0 %v2331_v58  ;;  %v2366_v10 = vand.u32 4294901760, %v419_v6 }
  0x45   : > { %548 = vmatpush.msrb.mxu2 %v2314_v52  ;;  %v2355_v5 = vand.u32 4294901760, %v413_v62 }
  0x46   : > { %699 = vrot.lane.b32.xlu1 %v2292_v31, %s2147_s21  ;;  %499 = vmatpush.msrb.mxu0 %v2344_v63 }
  0x47   : > { %550 = vmatpush.msrb.mxu2 %v2322_v56  ;;  %415 = vmatpush.msra.mxu1 %v2355_v5 }
  0x48   : > { %579 = vmatpush.msrb.mxu3 %v2355_v5 }
  0x49   : > { %421 = vmatpush.msra.mxu1 %v2366_v10 }
  0x4a   : > { %585 = vmatpush.msrb.mxu3 %v2366_v10 }
  0x4b   : > { %520 = vmatpush.msrb.mxu1 %v2314_v52 }
  0x4d   : > { %522 = vmatpush.msrb.mxu1 %v2322_v56 }
  0xae   : > { %v276_v32 = vpop.permute.xlu0 %275 }
  0xaf   : > { %v277_v33 = vsel %vm274_vm0, %v276_v32, %v2283_v16 }
  0xb0   : > { %v697_v34 = vpop.permute.xlu1 %696  ;;  %281 = vrot.lane.b32.xlu2 %v277_v33, %s2147_s21 }
  0xb1   : > { %v698_v35 = vsel %vm274_vm0, %v697_v34, %v2288_v24 }
  0xb2   : > { %702 = vrot.lane.b32.xlu0 %v698_v35, %s2147_s21 }
  0xb6   : > { %v279_v36 = vpop.permute.xlu0 %278 }
  0xb7   : > { %v280_v37 = vsel %vm274_vm0, %v279_v36, %v273_v30 }
  0xb8   : > { %v700_v38 = vpop.permute.xlu1 %699  ;;  %283 = vrot.lane.b32.xlu2 %v280_v37, %s2147_s21 }
  0xb9   : > { %v701_v39 = vsel %vm274_vm0, %v700_v38, %v2292_v31 }
  0xba   : > { %704 = vrot.lane.b32.xlu1 %v701_v39, %s2147_s21 }
 0x10a   : > { %v282_v40 = vpop.permute.xlu2 %281 }
 0x10b   : > { %v285_v41 = vsel %vm274_vm0, %v282_v40, %v2283_v16 }
 0x10c   : > { %290 = vrot.lane.b32.xlu2 %v285_v41, %s2148_s25  ;;  %299 = vrot.lane.b32.xlu1 %v285_v41, %s2149_s18 }
 0x112   : > { %v284_v42 = vpop.permute.xlu2 %283 }
 0x113   : > { %v286_v43 = vsel %vm274_vm0, %v284_v42, %v273_v30 }
 0x114   : > { %301 = vrot.lane.b32.xlu2 %v286_v43, %s2149_s18  ;;  %292 = vrot.lane.b32.xlu0 %v286_v43, %s2148_s25 }
 0x124   : > { %v703_v44 = vpop.permute.xlu0 %702 }
 0x125   : > { %v706_v45 = vsel %vm274_vm0, %v703_v44, %v2288_v24 }
 0x126   : > { %718 = vrot.lane.b32.xlu2 %v706_v45, %s2149_s18  ;;  %710 = vrot.lane.b32.xlu0 %v706_v45, %s2148_s25 }
 0x12c   : > { %v705_v46 = vpop.permute.xlu1 %704 }
 0x12d   : > { %v707_v47 = vsel %vm274_vm0, %v705_v46, %v2292_v31 }
 0x12e   : > { %720 = vrot.lane.b32.xlu0 %v707_v47, %s2149_s18  ;;  %712 = vrot.lane.b32.xlu1 %v707_v47, %s2148_s25 }
 0x166   : > { %v291_v49 = vpop.permute.xlu2 %290 }
 0x167   : > { %v296_v0 = vsel %vm287_vm1, 0.0, %v291_v49 }
 0x16e   : > { %v302_v61 = vpop.permute.xlu2 %301 }
 0x16f   : > { %v306_v7 = vsel %vm298_vm2, 0.0, %v302_v61 }
 0x170   : > { %v1112_v12 = vadd.f32 %v1110_v1, %v306_v7 }
 0x17e   : > { %v300_v54 = vpop.permute.xlu1 %299 }
 0x17f   : > { %v305_v60 = vsel %vm298_vm2, 0.0, %v300_v54 }
 0x180   : > { %v307_v3 = vsub.f32 %v296_v0, %v305_v60  ;;  %v1111_v14 = vadd.f32 %v1109_v2, %v305_v60  ;;  %v719_v6 = vpop.permute.xlu2 %718 }
 0x182   : > { %v309_v13 = vrot.slane %v307_v3, 7  ;;  %v321_v15 = vrot.slane %v307_v3, 1  ;;  %v317_v20 = vmul.f32 2.0, %v307_v3  ;;  %v1113_v25 = vadd.f32 %v1111_v14, %v296_v0 }
 0x183   : > { %v1491_v14 = vmul.f32 2.0, %v2288_v24  ;;  %v1492_v24 = vmul.f32 2.0, %v2292_v31 }
 0x184   : > { %v1115_v36 = vrot.slane %v1113_v25, 7  ;;  %v1121_v37 = vrot.slane %v1113_v25, 1 }
 0x186   : > { %v293_v8 = vpop.permute.xlu0 %292 }
 0x187   : > { %v297_v9 = vsel %vm287_vm1, 0.0, %v293_v8 }
 0x188   : > { %v308_v11 = vsub.f32 %v297_v9, %v306_v7  ;;  %v1114_v19 = vadd.f32 %v1112_v12, %v297_v9 }
 0x18a   : > { %v310_v16 = vrot.slane %v308_v11, 7  ;;  %v318_v17 = vmul.f32 2.0, %v308_v11  ;;  %v322_v18 = vrot.slane %v308_v11, 1  ;;  %v1116_v33 = vrot.slane %v1114_v19, 7 }
 0x18b   : > { %v1122_v34 = vrot.slane %v1114_v19, 1 }
 0x18c   : > { %v312_v21 = vsel %vm311_vm3, %v309_v13, %v310_v16  ;;  %v313_v22 = vsel %vm311_vm3, %v310_v16, %v309_v13  ;;  %v325_v23 = vsel %vm323_vm4, %v322_v18, %v321_v15  ;;  %v324_v30 = vsel %vm323_vm4, %v321_v15, %v322_v18 }
 0x18d   : > { %v315_v26 = vsel %vm311_vm3, 0.0, %v313_v22  ;;  %v320_v27 = vadd.f32 %v318_v17, %v312_v21  ;;  %v329_v28 = vsel %vm327_vm5, 0.0, %v325_v23  ;;  %v1118_v45 = vsel %vm311_vm3, %v1116_v33, %v1115_v36 }
 0x18e   : > { %v319_v29 = vadd.f32 %v317_v20, %v315_v26  ;;  %v1124_v46 = vsel %vm323_vm4, %v1122_v34, %v1121_v37  ;;  %v1117_v54 = vsel %vm311_vm3, %v1115_v36, %v1116_v33  ;;  %v1123_v60 = vsel %vm323_vm4, %v1121_v37, %v1122_v34 }
 0x18f   : > { %v331_v32 = vadd.f32 %v329_v28, %v320_v27  ;;  %v1119_v0 = vsel %vm311_vm3, 0.0, %v1118_v45  ;;  %v1126_v1 = vsel %vm327_vm5, 0.0, %v1124_v46  ;;  %v724_v16 = vsel %vm298_vm2, 0.0, %v719_v6 }
 0x190   : > { %v330_v35 = vadd.f32 %v324_v30, %v319_v29  ;;  %v1127_v12 = vsub.f32 %v1119_v0, %v1123_v60  ;;  %v1128_v13 = vsub.f32 %v1117_v54, %v1126_v1  ;;  %v1493_v25 = vadd.f32 %v1491_v14, %v724_v16 }
 0x191   : > { %v340_v38 = vsel %vm332_vm6, %v331_v32, 0.0  ;;  %v348_v39 = vmul.f32 %v331_v32, %v331_v32 }
 0x192   : > { %v333_v40 = vsel %vm332_vm6, %v330_v35, 0.0  ;;  %v341_v41 = vrot.slane %v340_v38, 4  ;;  %v347_v42 = vmul.f32 %v330_v35, %v330_v35  ;;  %v2410_v22 = vsel %vm332_vm6, %v1127_v12, 0.0 }
 0x193   : > { %v334_v43 = vrot.slane %v333_v40, 4  ;;  %v356_v44 = vsel %vm332_vm6, %v348_v39, 0.0  ;;  %v2413_v23 = vsel %vm332_vm6, %v1128_v13, 0.0  ;;  %v1130_v32 = vrot.slane %v2410_v22, 4 }
 0x194   : > { %v342_v47 = vadd.f32 %v341_v41, %v340_v38  ;;  %v349_v48 = vsel %vm332_vm6, %v347_v42, 0.0  ;;  %v357_v49 = vrot.slane %v356_v44, 4  ;;  %v1137_v33 = vrot.slane %v2413_v23, 4 }
 0x195   : > { %v335_v50 = vadd.f32 %v334_v43, %v333_v40  ;;  %v350_v53 = vrot.slane %v349_v48, 4  ;;  %v2422_v40 = vmul.f32 %v1127_v12, %v1127_v12  ;;  %v2424_v41 = vmul.f32 %v1128_v13, %v1128_v13 }
 0x196   : > { %v343_v61 = vrot.slane %v342_v47, 2  ;;  %v358_v62 = vadd.f32 %v357_v49, %v356_v44 }
 0x197   : > { %v336_v2 = vrot.slane %v335_v50, 2  ;;  %v351_v3 = vadd.f32 %v350_v53, %v349_v48 }
 0x198   : > { %v344_v7 = vadd.f32 %v343_v61, %v342_v47  ;;  %v359_v8 = vrot.slane %v358_v62, 2  ;;  %v711_v9 = vpop.permute.xlu0 %710 }
 0x199   : > { %v352_v11 = vrot.slane %v351_v3, 2  ;;  %v337_v17 = vadd.f32 %v336_v2, %v335_v50  ;;  %v716_v19 = vsel %vm287_vm1, 0.0, %v711_v9 }
 0x19a   : > { %v360_v15 = vadd.f32 %v359_v8, %v358_v62  ;;  %v345_v18 = vrot.slane %v344_v7, 1  ;;  %v726_v27 = vsub.f32 %v716_v19, %v724_v16  ;;  %v1495_v37 = vadd.f32 %v1493_v25, %v716_v19 }
 0x19b   : > { %v353_v20 = vadd.f32 %v352_v11, %v351_v3  ;;  %v338_v26 = vrot.slane %v337_v17, 1 }
 0x19c   : > { %v361_v21 = vrot.slane %v360_v15, 1  ;;  %v346_v28 = vadd.f32 %v345_v18, %v344_v7  ;;  %v728_v44 = vrot.slane %v726_v27, 7  ;;  %v734_v45 = vmul.f32 2.0, %v726_v27 }
 0x19d   : > { %v354_v29 = vrot.slane %v353_v20, 1  ;;  %v339_v36 = vadd.f32 %v338_v26, %v337_v17  ;;  %v738_v48 = vrot.slane %v726_v27, 1  ;;  %v1497_v54 = vrot.slane %v1495_v37, 7 }
 0x19e   : > { %v362_v30 = vadd.f32 %v361_v21, %v360_v15  ;;  %v1503_v51 = vrot.slane %v1495_v37, 1 }
 0x19f   : > { %v355_v39 = vadd.f32 %v354_v29, %v353_v20  ;;  %v366_v46 = vsel %vm365_vm7, %v346_v28, %v339_v36 }
 0x1a0   : > { %v721_v34 = vpop.permute.xlu0 %720  ;;  %v713_v35 = vpop.permute.xlu1 %712  ;;  %v367_v61 = vsel %vm332_vm6, %v366_v46, 0 }
 0x1a1   : > { %v725_v38 = vsel %vm298_vm2, 0.0, %v721_v34  ;;  %v717_v31 = vsel %vm287_vm1, 0.0, %v713_v35  ;;  %v530_v47 = vsel %vm365_vm7, %v362_v30, %v355_v39  ;;  %v2442_v13 = vand.u32 4294901760, %v367_v61 }
 0x1a2   : > { %v1494_v42 = vadd.f32 %v1492_v24, %v725_v38  ;;  %v727_v43 = vsub.f32 %v717_v31, %v725_v38  ;;  %v531_v2 = vsel %vm332_vm6, %v530_v47, 0 }
 0x1a3   : > { %v2448_v17 = vand.u32 4294901760, %v531_v2  ;;  %423 = vmatmul.f32.vlgmr.msra.gmra.mxu1 %v2442_v13 }
 0x1a4   : > { %v729_v49 = vrot.slane %v727_v43, 7  ;;  %v735_v50 = vmul.f32 2.0, %v727_v43  ;;  %v739_v53 = vrot.slane %v727_v43, 1  ;;  %v1496_v60 = vadd.f32 %v1494_v42, %v717_v31  ;;  %632 = vmatpush.msra.mxu1 %v2314_v52 }
 0x1a6   : > { %v730_v62 = vsel %vm311_vm3, %v728_v44, %v729_v49  ;;  %v731_v0 = vsel %vm311_vm3, %v729_v49, %v728_v44  ;;  %v741_v1 = vsel %vm323_vm4, %v739_v53, %v738_v48  ;;  %v1498_v8 = vrot.slane %v1496_v60, 7  ;;  %634 = vmatpush.msra.mxu1 %v2322_v56 }
 0x1a7   : > { %v732_v3 = vsel %vm311_vm3, 0.0, %v731_v0  ;;  %v737_v6 = vadd.f32 %v735_v50, %v730_v62  ;;  %v743_v7 = vsel %vm327_vm5, 0.0, %v741_v1  ;;  %v740_v11 = vsel %vm323_vm4, %v738_v48, %v739_v53 }
 0x1a8   : > { %v736_v9 = vadd.f32 %v734_v45, %v732_v3  ;;  %v1504_v12 = vrot.slane %v1496_v60, 1  ;;  %v1499_v15 = vsel %vm311_vm3, %v1497_v54, %v1498_v8  ;;  %v1500_v16 = vsel %vm311_vm3, %v1498_v8, %v1497_v54 }
 0x1a9   : > { %v745_v14 = vadd.f32 %v743_v7, %v737_v6  ;;  %v1501_v19 = vsel %vm311_vm3, 0.0, %v1500_v16  ;;  %v2469_v50 = vsel %vm332_vm6, %v2422_v40, 0.0  ;;  %v2475_v60 = vsel %vm332_vm6, %v2424_v41, 0.0 }
 0x1aa   : > { %v744_v18 = vadd.f32 %v740_v11, %v736_v9  ;;  %v1505_v20 = vsel %vm323_vm4, %v1503_v51, %v1504_v12  ;;  %v1506_v21 = vsel %vm323_vm4, %v1504_v12, %v1503_v51  ;;  %v388_v40 = vsub.f32 %v367_v61, %v2442_v13 }
 0x1ab   : > { %v753_v25 = vsel %vm332_vm6, %v745_v14, 0.0  ;;  %v761_v24 = vmul.f32 %v745_v14, %v745_v14  ;;  %v1508_v26 = vsel %vm327_vm5, 0.0, %v1506_v21  ;;  %v1509_v27 = vsub.f32 %v1501_v19, %v1505_v20  ;;  %524 = vmatmul.f32.vlgmr.msrb.gmra.mxu1 %v2442_v13 }
 0x1ac   : > { %v746_v28 = vsel %vm332_vm6, %v744_v18, 0.0  ;;  %v754_v29 = vrot.slane %v753_v25, 4  ;;  %v760_v30 = vmul.f32 %v744_v18, %v744_v18  ;;  %v1510_v34 = vsub.f32 %v1499_v15, %v1508_v26  ;;  %827 = vmatpush.msrb.mxu1 %v2355_v5  ;;  %449 = vmatmul.f32.vlgmr.msra.gmra.mxu2 %v388_v40 }
 0x1ad   : > { %v747_v35 = vrot.slane %v746_v28, 4  ;;  %v769_v57 = vsel %vm332_vm6, %v761_v24, 0.0  ;;  %v1511_v36 = vsel %vm332_vm6, %v1509_v27, 0.0  ;;  %v1525_v37 = vmul.f32 %v1509_v27, %v1509_v27  ;;  %659 = vmatpush.msra.mxu2 %v2331_v58 }
 0x1ae   : > { %v755_v38 = vadd.f32 %v754_v29, %v753_v25  ;;  %v762_v4 = vsel %vm332_vm6, %v760_v30, 0.0  ;;  %v770_v31 = vrot.slane %v769_v57, 4  ;;  %v1512_v39 = vrot.slane %v1511_v36, 4  ;;  %833 = vmatpush.msrb.mxu1 %v2366_v10 }
 0x1af   : > { %v748_v42 = vadd.f32 %v747_v35, %v746_v28  ;;  %v763_v43 = vrot.slane %v762_v4, 4  ;;  %v1518_v44 = vsel %vm332_vm6, %v1510_v34, 0.0  ;;  %v1526_v45 = vmul.f32 %v1510_v34, %v1510_v34  ;;  %663 = vmatpush.msra.mxu2 %v2344_v63 }
 0x1b0   : > { %v756_v46 = vrot.slane %v755_v38, 2  ;;  %v771_v47 = vadd.f32 %v770_v31, %v769_v57  ;;  %v1513_v48 = vadd.f32 %v1512_v39, %v1511_v36  ;;  %v1519_v49 = vrot.slane %v1518_v44, 4 }
 0x1b1   : > { %v764_v53 = vadd.f32 %v763_v43, %v762_v4  ;;  %v1527_v54 = vsel %vm332_vm6, %v1525_v37, 0.0  ;;  %v1534_v51 = vsel %vm332_vm6, %v1526_v45, 0.0  ;;  %v749_v62 = vrot.slane %v748_v42, 2 }
 0x1b2   : > { %v772_v0 = vrot.slane %v771_v47, 2  ;;  %v1520_v1 = vadd.f32 %v1519_v49, %v1518_v44  ;;  %v1528_v6 = vrot.slane %v1527_v54, 4  ;;  %v1535_v7 = vrot.slane %v1534_v51, 4 }
 0x1b3   : > { %v765_v3 = vrot.slane %v764_v53, 2  ;;  %v757_v8 = vadd.f32 %v756_v46, %v755_v38  ;;  %v1514_v11 = vrot.slane %v1513_v48, 2  ;;  %v2481_v12 = vsub.f32 %v531_v2, %v2448_v17 }
 0x1b4   : > { %v773_v9 = vadd.f32 %v772_v0, %v771_v47  ;;  %v1529_v14 = vadd.f32 %v1528_v6, %v1527_v54  ;;  %v1536_v15 = vadd.f32 %v1535_v7, %v1534_v51  ;;  %v389_v16 = vand.u32 4294901760, %v388_v40 }
 0x1b5   : > { %v766_v41 = vadd.f32 %v765_v3, %v764_v53  ;;  %v1521_v19 = vrot.slane %v1520_v1, 2  ;;  %v553_v20 = vand.u32 4294901760, %v2481_v12  ;;  %v750_v61 = vadd.f32 %v749_v62, %v748_v42 }
 0x1b6   : > { %v774_v18 = vrot.slane %v773_v9, 1  ;;  %v1530_v25 = vrot.slane %v1529_v14, 2  ;;  %v1537_v24 = vrot.slane %v1536_v15, 2  ;;  %474 = vmatmul.f32.vlgmr.msra.gmra.mxu3 %v389_v16  ;;  %v390_v2 = vsub.f32 %v388_v40, %v389_v16 }
 0x1b7   : > { %v767_v21 = vrot.slane %v766_v41, 1  ;;  %v554_v26 = vsub.f32 %v2481_v12, %v553_v20  ;;  %684 = vmatpush.msra.mxu3 %v2314_v52  ;;  %v751_v27 = vrot.slane %v750_v61, 1  ;;  %v758_v28 = vrot.slane %v757_v8, 1  ;;  %638 = vmatmul.f32.vlgmr.msra.gmra.mxu1 %v553_v20 }
 0x1b8   : > { %v775_v29 = vadd.f32 %v774_v18, %v773_v9  ;;  %v1531_v30 = vadd.f32 %v1530_v25, %v1529_v14  ;;  %v1538_v34 = vadd.f32 %v1537_v24, %v1536_v15  ;;  %v391_v35 = vand.u32 4294901760, %v390_v2  ;;  %932 = vmatpush.msra.mxu1 %v2314_v52 }
 0x1b9   : > { %v768_v57 = vadd.f32 %v767_v21, %v766_v41  ;;  %v1515_v36 = vadd.f32 %v1514_v11, %v1513_v48  ;;  %v555_v37 = vand.u32 4294901760, %v554_v26  ;;  %686 = vmatpush.msra.mxu3 %v2322_v56  ;;  %v752_v38 = vadd.f32 %v751_v27, %v750_v61 }
 0x1ba   : > { %v759_v4 = vadd.f32 %v758_v28, %v757_v8  ;;  %v1522_v31 = vadd.f32 %v1521_v19, %v1520_v1  ;;  %v1532_v39 = vrot.slane %v1531_v30, 1  ;;  %v1539_v42 = vrot.slane %v1538_v34, 1  ;;  %392 = vmatmul.f32.vlgmr.msra.gmra.mxu0 %v391_v35  ;;  %934 = vmatpush.msra.mxu1 %v2322_v56 }
 0x1bb   : > { %v942_v43 = vsel %vm365_vm7, %v775_v29, %v768_v57  ;;  %v1131_v44 = vadd.f32 %v1130_v32, %v2410_v22  ;;  %v1146_v45 = vrot.slane %v2469_v50, 4  ;;  %607 = vmatpush.msra.mxu0 %v2320_v55  ;;  %v1153_v47 = vrot.slane %v2475_v60, 4  ;;  %556 = vmatmul.f32.vlgmr.msrb.gmra.mxu2 %v555_v37 }
 0x1bc   : > { %v778_v46 = vsel %vm365_vm7, %v759_v4, %v752_v38  ;;  %v1533_v48 = vadd.f32 %v1532_v39, %v1531_v30  ;;  %v1540_v49 = vadd.f32 %v1539_v42, %v1538_v34  ;;  %v1138_v54 = vadd.f32 %v1137_v33, %v2413_v23  ;;  %855 = vmatpush.msrb.mxu2 %v2320_v55 }
 0x1bd   : > { %v779_v53 = vsel %vm332_vm6, %v778_v46, 0  ;;  %610 = vmatpush.msra.mxu0 %v2334_v59  ;;  %v943_v32 = vsel %vm332_vm6, %v942_v43, 0  ;;  %v1516_v51 = vrot.slane %v1515_v36, 1  ;;  %v1523_v62 = vrot.slane %v1522_v31, 1 }
 0x1be   : > { %v2506_v22 = vand.u32 4294901760, %v779_v53  ;;  %587 = vmatmul.f32.vlgmr.msrb.gmra.mxu3 %v2448_v17  ;;  %v1707_v0 = vsel %vm365_vm7, %v1540_v49, %v1533_v48  ;;  %v1147_v1 = vadd.f32 %v1146_v45, %v2469_v50  ;;  %858 = vmatpush.msrb.mxu2 %v2334_v59  ;;  %v1154_v33 = vadd.f32 %v1153_v47, %v2475_v60 }
 0x1bf   : > { %880 = vmatpush.msrb.mxu3 %v2314_v52  ;;  %v2515_v23 = vsel %vm332_vm6, %v1707_v0, 0  ;;  %v2518_v3 = vand.u32 4294901760, %v943_v32  ;;  %v1517_v6 = vadd.f32 %v1516_v51, %v1515_v36  ;;  %v1524_v7 = vadd.f32 %v1523_v62, %v1522_v31 }
 0x1c0   : > { %v1132_v40 = vrot.slane %v1131_v44, 2  ;;  %v1139_v8 = vrot.slane %v1138_v54, 2  ;;  %835 = vmatmul.f32.vlgmr.msrb.gmra.mxu1 %v2506_v22  ;;  %v800_v50 = vsub.f32 %v779_v53, %v2506_v22  ;;  %v1148_v11 = vrot.slane %v1147_v1, 2 }
 0x1c1   : > { %882 = vmatpush.msrb.mxu3 %v2322_v56  ;;  %1044 = vmatpush.msrb.mxu1 %v2314_v52  ;;  %v1543_v9 = vsel %vm365_vm7, %v1524_v7, %v1517_v6  ;;  %v1155_v41 = vrot.slane %v1154_v33, 2  ;;  %v2532_v14 = vsub.f32 %v943_v32, %v2518_v3  ;;  %v1728_v48 = vand.u32 4294901760, %v2515_v23 }
 0x1c2   : > { %501 = vmatmul.f32.vlgmr.msrb.gmra.mxu0 %v2442_v13  ;;  %v2528_v60 = vsel %vm332_vm6, %v1543_v9, 0  ;;  %v1133_v13 = vadd.f32 %v1132_v40, %v1131_v44  ;;  %v1140_v15 = vadd.f32 %v1139_v8, %v1138_v54  ;;  %v801_v16 = vand.u32 4294901760, %v800_v50 }
 0x1c3   : > { %796 = vmatpush.msrb.mxu0 %v2314_v52  ;;  %665 = vmatmul.f32.vlgmr.msra.gmra.mxu2 %v2448_v17  ;;  %v1149_v18 = vadd.f32 %v1148_v11, %v1147_v1  ;;  %v1156_v19 = vadd.f32 %v1155_v41, %v1154_v33  ;;  %v965_v20 = vand.u32 4294901760, %v2532_v14  ;;  %v1564_v47 = vand.u32 4294901760, %v2528_v60 }
 0x1c4   : > { %1046 = vmatpush.msrb.mxu1 %v2322_v56  ;;  %960 = vmatpush.msra.mxu2 %v2314_v52  ;;  %v1134_v61 = vrot.slane %v1133_v13, 1  ;;  %v1141_v21 = vrot.slane %v1140_v15, 1  ;;  %v802_v25 = vsub.f32 %v800_v50, %v801_v16  ;;  %v1729_v53 = vsub.f32 %v2515_v23, %v1728_v48 }
 0x1c5   : > { %798 = vmatpush.msrb.mxu0 %v2322_v56  ;;  %v1157_v24 = vrot.slane %v1156_v19, 1  ;;  %v966_v2 = vsub.f32 %v2532_v14, %v965_v20  ;;  %v1565_v49 = vsub.f32 %v2528_v60, %v1564_v47 }
 0x1c6   : > { %688 = vmatmul.f32.vlgmr.msra.gmra.mxu3 %v2448_v17  ;;  %962 = vmatpush.msra.mxu2 %v2322_v56  ;;  %v1150_v17 = vrot.slane %v1149_v18, 1  ;;  %v1135_v26 = vadd.f32 %v1134_v61, %v1133_v13  ;;  %v1142_v27 = vadd.f32 %v1141_v21, %v1140_v15 }
 0x1c7   : > { %991 = vmatpush.msra.mxu3 %v2355_v5  ;;  %v1158_v29 = vadd.f32 %v1157_v24, %v1156_v19  ;;  %v967_v30 = vand.u32 4294901760, %v966_v2  ;;  %v1566_v54 = vand.u32 4294901760, %v1565_v49 }
 0x1c8   : > { %936 = vmatmul.f32.vlgmr.msra.gmra.mxu1 %v2506_v22  ;;  %v1151_v28 = vadd.f32 %v1150_v17, %v1149_v18  ;;  %v1161_v34 = vsel %vm365_vm7, %v1142_v27, %v1135_v26 }
 0x1c9   : > { %997 = vmatpush.msra.mxu3 %v2366_v10  ;;  %1210 = vmatpush.msra.mxu1 %v2355_v5  ;;  %v1162_v35 = vsel %vm332_vm6, %v1161_v34, 0  ;;  %v1567_v32 = vsub.f32 %v1565_v49, %v1566_v54 }
 0x1ca   : > { %613 = vmatmul.f32.vlgmr.msra.gmra.mxu0 %v2481_v12  ;;  %v803_v12 = vand.u32 4294901760, %v802_v25  ;;  %v1325_v57 = vsel %vm365_vm7, %v1158_v29, %v1151_v28  ;;  %v1182_v36 = vand.u32 4294901760, %v1162_v35 }
 0x1cb   : > { %907 = vmatpush.msra.mxu0 %v2331_v58  ;;  %861 = vmatmul.f32.vlgmr.msrb.gmra.mxu2 %v800_v50  ;;  %v1326_v37 = vsel %vm332_vm6, %v1325_v57, 0 }
 0x1cc   : > { %1216 = vmatpush.msra.mxu1 %v2366_v10  ;;  %1071 = vmatpush.msrb.mxu2 %v2331_v58  ;;  %v1346_v38 = vand.u32 4294901760, %v1326_v37  ;;  %v1183_v4 = vsub.f32 %v1162_v35, %v1182_v36 }
 0x1cd   : > { %911 = vmatpush.msra.mxu0 %v2344_v63 }
 0x1ce   : > { %886 = vmatmul.f32.vlgmr.msrb.gmra.mxu3 %v801_v16  ;;  %1075 = vmatpush.msrb.mxu2 %v2344_v63  ;;  %v1347_v31 = vsub.f32 %v1326_v37, %v1346_v38  ;;  %v1184_v39 = vand.u32 4294901760, %v1183_v4 }
 0x1cf   : > { %1096 = vmatpush.msrb.mxu3 %v2314_v52 }
 0x1d0   : > { %1050 = vmatmul.f32.vlgmr.msrb.gmra.mxu1 %v965_v20  ;;  %v1348_v42 = vand.u32 4294901760, %v1347_v31  ;;  %v1185_v43 = vsub.f32 %v1183_v4, %v1184_v39 }
 0x1d1   : > { %1098 = vmatpush.msrb.mxu3 %v2322_v56  ;;  %1315 = vmatpush.msrb.mxu1 %v2314_v52 }
 0x1d2   : > { %804 = vmatmul.f32.vlgmr.msrb.gmra.mxu0 %v803_v12  ;;  %v1349_v44 = vsub.f32 %v1347_v31, %v1348_v42  ;;  %v1186_v45 = vand.u32 4294901760, %v1185_v43 }
 0x1d3   : > { %1019 = vmatpush.msrb.mxu0 %v2320_v55  ;;  %968 = vmatmul.f32.vlgmr.msra.gmra.mxu2 %v967_v30 }
 0x1d4   : > { %1317 = vmatpush.msrb.mxu1 %v2322_v56  ;;  %1238 = vmatpush.msra.mxu2 %v2320_v55  ;;  %v1350_v46 = vand.u32 4294901760, %v1349_v44 }
 0x1d5   : > { %1022 = vmatpush.msrb.mxu0 %v2334_v59 }
 0x1d6   : > { %999 = vmatmul.f32.vlgmr.msra.gmra.mxu3 %v2518_v3  ;;  %1241 = vmatpush.msra.mxu2 %v2334_v59 }
 0x1d7   : > { %1263 = vmatpush.msra.mxu3 %v2314_v52 }
 0x1d8   : > { %1218 = vmatmul.f32.vlgmr.msra.gmra.mxu1 %v1182_v36 }
 0x1d9   : > { %1265 = vmatpush.msra.mxu3 %v2322_v56  ;;  %1427 = vmatpush.msra.mxu1 %v2314_v52 }
 0x1da   : > { %913 = vmatmul.f32.vlgmr.msra.gmra.mxu0 %v2506_v22  ;;  %v1730_v22 = vand.u32 4294901760, %v1729_v53 }
 0x1db   : > { %1179 = vmatpush.msra.mxu0 %v2314_v52  ;;  %1077 = vmatmul.f32.vlgmr.msrb.gmra.mxu2 %v2518_v3 }
 0x1dc   : > { %1429 = vmatpush.msra.mxu1 %v2322_v56  ;;  %1343 = vmatpush.msrb.mxu2 %v2314_v52  ;;  %v1731_v51 = vsub.f32 %v1729_v53, %v1730_v22 }
 0x1dd   : > { %1181 = vmatpush.msra.mxu0 %v2322_v56 }
 0x1de   : > { %1100 = vmatmul.f32.vlgmr.msrb.gmra.mxu3 %v2518_v3  ;;  %1345 = vmatpush.msrb.mxu2 %v2322_v56 }
 0x1df   : > { %1374 = vmatpush.msrb.mxu3 %v2355_v5 }
 0x1e0   : > { %1319 = vmatmul.f32.vlgmr.msrb.gmra.mxu1 %v1182_v36 }
 0x1e1   : > { %1380 = vmatpush.msrb.mxu3 %v2366_v10  ;;  %1592 = vmatpush.msrb.mxu1 %v2355_v5 }
 0x1e2   : > { %1025 = vmatmul.f32.vlgmr.msrb.gmra.mxu0 %v2532_v14 }
 0x1e3   : > { %1290 = vmatpush.msrb.mxu0 %v2331_v58  ;;  %1244 = vmatmul.f32.vlgmr.msra.gmra.mxu2 %v1183_v4 }
 0x1e4   : > { %1598 = vmatpush.msrb.mxu1 %v2366_v10  ;;  %1454 = vmatpush.msra.mxu2 %v2331_v58 }
 0x1e5   : > { %1294 = vmatpush.msrb.mxu0 %v2344_v63 }
 0x1e6   : > { %1269 = vmatmul.f32.vlgmr.msra.gmra.mxu3 %v1184_v39  ;;  %1458 = vmatpush.msra.mxu2 %v2344_v63 }
 0x1e7   : > { %1479 = vmatpush.msra.mxu3 %v2314_v52 }
 0x1e8   : > { %1433 = vmatmul.f32.vlgmr.msra.gmra.mxu1 %v1348_v42 }
 0x1e9   : > { %1481 = vmatpush.msra.mxu3 %v2322_v56  ;;  %1697 = vmatpush.msra.mxu1 %v2314_v52 }
 0x1ea   : > { %1187 = vmatmul.f32.vlgmr.msra.gmra.mxu0 %v1186_v45 }
 0x1eb   : > { %1402 = vmatpush.msra.mxu0 %v2320_v55  ;;  %1351 = vmatmul.f32.vlgmr.msrb.gmra.mxu2 %v1350_v46 }
 0x1ec   : > { %1699 = vmatpush.msra.mxu1 %v2322_v56  ;;  %1620 = vmatpush.msrb.mxu2 %v2320_v55 }
 0x1ed   : > { %1405 = vmatpush.msra.mxu0 %v2334_v59 }
 0x1ee   : > { %1382 = vmatmul.f32.vlgmr.msrb.gmra.mxu3 %v1346_v38  ;;  %1623 = vmatpush.msrb.mxu2 %v2334_v59 }
 0x1ef   : > { %1645 = vmatpush.msrb.mxu3 %v2314_v52 }
 0x1f0   : > { %1600 = vmatmul.f32.vlgmr.msrb.gmra.mxu1 %v1564_v47 }
 0x1f1   : > { %1647 = vmatpush.msrb.mxu3 %v2322_v56  ;;  %1809 = vmatpush.msrb.mxu1 %v2314_v52 }
 0x1f2   : > { %1296 = vmatmul.f32.vlgmr.msrb.gmra.mxu0 %v1182_v36 }
 0x1f3   : > { %1561 = vmatpush.msrb.mxu0 %v2314_v52  ;;  %1460 = vmatmul.f32.vlgmr.msra.gmra.mxu2 %v1346_v38 }
 0x1f4   : > { %1811 = vmatpush.msrb.mxu1 %v2322_v56  ;;  %1725 = vmatpush.msra.mxu2 %v2314_v52 }
 0x1f5   : > { %1563 = vmatpush.msrb.mxu0 %v2322_v56 }
 0x1f6   : > { %1483 = vmatmul.f32.vlgmr.msra.gmra.mxu3 %v1346_v38  ;;  %1727 = vmatpush.msra.mxu2 %v2322_v56 }
 0x1f7   : > { %1756 = vmatpush.msra.mxu3 %v2355_v5  ;;  %v1568_v5 = vand.u32 4294901760, %v1567_v32 }
 0x1f8   : > { %1701 = vmatmul.f32.vlgmr.msra.gmra.mxu1 %v1564_v47 }
 0x1f9   : > { %1762 = vmatpush.msra.mxu3 %v2366_v10  ;;  %v1732_v10 = vand.u32 4294901760, %v1731_v51 }
 0x1fa   : > { %1408 = vmatmul.f32.vlgmr.msra.gmra.mxu0 %v1347_v31 }
 0x1fb   : > { %1672 = vmatpush.msra.mxu0 %v2331_v58  ;;  %1626 = vmatmul.f32.vlgmr.msrb.gmra.mxu2 %v1565_v49 }
 0x1fc   : > { %1836 = vmatpush.msrb.mxu2 %v2331_v58 }
 0x1fd   : > { %1676 = vmatpush.msra.mxu0 %v2344_v63 }
 0x1fe   : > { %1651 = vmatmul.f32.vlgmr.msrb.gmra.mxu3 %v1566_v54  ;;  %1840 = vmatpush.msrb.mxu2 %v2344_v63 }
 0x1ff   : > { %1861 = vmatpush.msrb.mxu3 %v2314_v52 }
 0x200   : > { %1815 = vmatmul.f32.vlgmr.msrb.gmra.mxu1 %v1730_v22 }
 0x201   : > { %1863 = vmatpush.msrb.mxu3 %v2322_v56 }
 0x202   : > { %1569 = vmatmul.f32.vlgmr.msrb.gmra.mxu0 %v1568_v5 }
 0x203   : > { %1784 = vmatpush.msrb.mxu0 %v2320_v55  ;;  %1733 = vmatmul.f32.vlgmr.msra.gmra.mxu2 %v1732_v10 }
 0x205   : > { %1787 = vmatpush.msrb.mxu0 %v2334_v59 }
 0x206   : > { %1764 = vmatmul.f32.vlgmr.msra.gmra.mxu3 %v1728_v48 }
 0x20a   : > { %1678 = vmatmul.f32.vlgmr.msra.gmra.mxu0 %v1564_v47 }
 0x20b   : > { %1842 = vmatmul.f32.vlgmr.msrb.gmra.mxu2 %v1728_v48 }
 0x20e   : > { %1865 = vmatmul.f32.vlgmr.msrb.gmra.mxu3 %v1728_v48 }
 0x212   : > { %1790 = vmatmul.f32.vlgmr.msrb.gmra.mxu0 %v1729_v53 }
 0x220   : > { %v424_v58 = vpop.f32.mrf.mxu1 }
 0x228   : > { %v525_v52 = vpop.f32.mrf.mxu1 }
 0x22f   : > { %v450_v0 = vpop.f32.mrf.mxu2 }
 0x234   : > { %v639_v62 = vpop.f32.mrf.mxu1 }
 0x237   : > { %v393_v63 = vpop.f32.mrf.mxu0 }
 0x238   : > { %v425_v1 = vadd.f32 %v424_v58, %v393_v63 }
 0x239   : > { %v475_v23 = vpop.f32.mrf.mxu3 }
 0x23a   : > { %v451_v56 = vadd.f32 %v450_v0, %v425_v1 }
 0x23c   : > { %v476_v33 = vadd.f32 %v475_v23, %v451_v56 }
 0x23d   : > { %v836_v7 = vpop.f32.mrf.mxu1 }
 0x23e   : > { %v557_v6 = vpop.f32.mrf.mxu2 }
 0x23f   : > { %v502_v3 = vpop.f32.mrf.mxu0 }
 0x240   : > { %v503_v55 = vadd.f32 %v502_v3, %v476_v33 }
 0x241   : > { %v588_v40 = vpop.f32.mrf.mxu3 }
 0x242   : > { %v526_v59 = vadd.f32 %v525_v52, %v503_v55  ;;  %v589_v8 = vadd.f32 %v588_v40, %v557_v6 }
 0x244   : > { %v692_v41 = vmul.f32 %v526_v59, %v526_v59 }
 0x245   : > { %v937_v13 = vpop.f32.mrf.mxu1 }
 0x246   : > { %v666_v9 = vpop.f32.mrf.mxu2  ;;  %v2614_v16 = vmul.f32 0.015625, %v692_v41 }
 0x247   : > { %v614_v50 = vpop.f32.mrf.mxu0 }
 0x248   : > { %v615_v60 = vadd.f32 %v614_v50, %v589_v8 }
 0x249   : > { %v689_v11 = vpop.f32.mrf.mxu3 }
 0x24a   : > { %v640_v14 = vadd.f32 %v639_v62, %v615_v60 }
 0x24c   : > { %v667_v15 = vadd.f32 %v666_v9, %v640_v14 }
 0x24d   : > { %v1051_v25 = vpop.f32.mrf.mxu1 }
 0x24e   : > { %v2616_v18 = vadd.f32 %v689_v11, %v667_v15  ;;  %v862_v20 = vpop.f32.mrf.mxu2 }
 0x24f   : > { %v805_v19 = vpop.f32.mrf.mxu0 }
 0x250   : > { %v694_v61 = vsub.f32 %v2616_v18, %v2614_v16  ;;  %v837_v42 = vadd.f32 %v836_v7, %v805_v19 }
 0x251   : > { %v887_v21 = vpop.f32.mrf.mxu3 }
 0x252   : > { %v863_v44 = vadd.f32 %v862_v20, %v837_v42 }
 0x254   : > { %v888_v54 = vadd.f32 %v887_v21, %v863_v44 }
 0x255   : > { %v1219_v26 = vpop.f32.mrf.mxu1 }
 0x256   : > { %v969_v24 = vpop.f32.mrf.mxu2 }
 0x257   : > { %v914_v17 = vpop.f32.mrf.mxu0 }
 0x258   : > { %v915_v51 = vadd.f32 %v914_v17, %v888_v54 }
 0x259   : > { %v1000_v2 = vpop.f32.mrf.mxu3 }
 0x25a   : > { %v1001_v48 = vadd.f32 %v1000_v2, %v969_v24  ;;  %v938_v1 = vadd.f32 %v937_v13, %v915_v51 }
 0x25c   : > { %v1104_v40 = vmul.f32 %v938_v1, %v938_v1 }
 0x25d   : > { %v1320_v34 = vpop.f32.mrf.mxu1 }
 0x25e   : > { %v1078_v12 = vpop.f32.mrf.mxu2  ;;  %v1105_v41 = vmul.f32 0.015625, %v1104_v40 }
 0x25f   : > { %v1026_v27 = vpop.f32.mrf.mxu0 }
 0x260   : > { %v1027_v22 = vadd.f32 %v1026_v27, %v1001_v48 }
 0x261   : > { %v1101_v28 = vpop.f32.mrf.mxu3 }
 0x262   : > { %v1052_v58 = vadd.f32 %v1051_v25, %v1027_v22 }
 0x264   : > { %v1079_v3 = vadd.f32 %v1078_v12, %v1052_v58 }
 0x265   : > { %v1434_v38 = vpop.f32.mrf.mxu1 }
 0x266   : > { %v1245_v30 = vpop.f32.mrf.mxu2  ;;  %v1102_v8 = vadd.f32 %v1101_v28, %v1079_v3 }
 0x267   : > { %v1188_v29 = vpop.f32.mrf.mxu0 }
 0x268   : > { %v1220_v45 = vadd.f32 %v1219_v26, %v1188_v29  ;;  %v1106_v20 = vsub.f32 %v1102_v8, %v1105_v41 }
 0x269   : > { %v1270_v35 = vpop.f32.mrf.mxu3 }
 0x26a   : > { %v1246_v32 = vadd.f32 %v1245_v30, %v1220_v45  ;;  %v1107_v27 = vmul.f32 0.015873017, %v1106_v20  ;;  %v695_v30 = vmul.f32 0.015873017, %v694_v61 }
 0x26c   : > { %v1271_v52 = vadd.f32 %v1270_v35, %v1246_v32 }
 0x26d   : > { %v1601_v43 = vpop.f32.mrf.mxu1 }
 0x26e   : > { %v1352_v36 = vpop.f32.mrf.mxu2 }
 0x26f   : > { %v1297_v57 = vpop.f32.mrf.mxu0 }
 0x270   : > { %v1298_v23 = vadd.f32 %v1297_v57, %v1271_v52 }
 0x271   : > { %v1383_v37 = vpop.f32.mrf.mxu3 }
 0x272   : > { %v1384_v5 = vadd.f32 %v1383_v37, %v1352_v36  ;;  %v1321_v59 = vadd.f32 %v1320_v34, %v1298_v23  ;;  %v1108_v36 = vsub.f32 %v695_v30, %v1107_v27 }
 0x274   : > { %v1487_v14 = vmul.f32 %v1321_v59, %v1321_v59 }
 0x275   : > { %v1702_v63 = vpop.f32.mrf.mxu1 }
 0x276   : > { %v1461_v31 = vpop.f32.mrf.mxu2  ;;  %v1488_v24 = vmul.f32 0.015625, %v1487_v14 }
 0x277   : > { %v1409_v4 = vpop.f32.mrf.mxu0 }
 0x278   : > { %v1410_v62 = vadd.f32 %v1409_v4, %v1384_v5 }
 0x279   : > { %v1484_v39 = vpop.f32.mrf.mxu3 }
 0x27a   : > { %v1435_v6 = vadd.f32 %v1434_v38, %v1410_v62  ;;  %v1874_v38 = vmul.f32 %v1108_v36, %v1108_v36 }
 0x27c   : > { %v1462_v50 = vadd.f32 %v1461_v31, %v1435_v6 }
 0x27d   : > { %v1816_v19 = vpop.f32.mrf.mxu1 }
 0x27e   : > { %v1627_v47 = vpop.f32.mrf.mxu2  ;;  %v1485_v13 = vadd.f32 %v1484_v39, %v1462_v50 }
 0x27f   : > { %v1570_v46 = vpop.f32.mrf.mxu0 }
 0x280   : > { %v1602_v49 = vadd.f32 %v1601_v43, %v1570_v46  ;;  %v1489_v12 = vsub.f32 %v1485_v13, %v1488_v24 }
 0x281   : > { %v1652_v53 = vpop.f32.mrf.mxu3 }
 0x282   : > { %v1628_v10 = vadd.f32 %v1627_v47, %v1602_v49  ;;  %v1490_v35 = vmul.f32 0.015873017, %v1489_v12 }
 0x284   : > { %v1653_v56 = vadd.f32 %v1652_v53, %v1628_v10 }
 0x286   : > { %v1734_v33 = vpop.f32.mrf.mxu2 }
 0x287   : > { %v1679_v0 = vpop.f32.mrf.mxu0 }
 0x288   : > { %v1680_v55 = vadd.f32 %v1679_v0, %v1653_v56 }
 0x289   : > { %v1765_v7 = vpop.f32.mrf.mxu3 }
 0x28a   : > { %v1703_v9 = vadd.f32 %v1702_v63, %v1680_v55  ;;  %v1766_v60 = vadd.f32 %v1765_v7, %v1734_v33 }
 0x28c   : > { %v1869_v21 = vmul.f32 %v1703_v9, %v1703_v9 }
 0x28e   : > { %v1843_v17 = vpop.f32.mrf.mxu2  ;;  %v1870_v29 = vmul.f32 0.015625, %v1869_v21 }
 0x28f   : > { %v1791_v11 = vpop.f32.mrf.mxu0 }
 0x290   : > { %v1792_v15 = vadd.f32 %v1791_v11, %v1766_v60 }
 0x291   : > { %v1866_v26 = vpop.f32.mrf.mxu3 }
 0x292   : > { %v1817_v25 = vadd.f32 %v1816_v19, %v1792_v15 }
 0x294   : > { %v1844_v2 = vadd.f32 %v1843_v17, %v1817_v25 }
 0x296   : > { %v1867_v28 = vadd.f32 %v1866_v26, %v1844_v2 }
 0x298   : > { %v1871_v34 = vsub.f32 %v1867_v28, %v1870_v29 }
 0x29a   : > { %v1872_v57 = vmul.f32 0.015873017, %v1871_v34 }
 0x29c   : > { %v1873_v37 = vsub.f32 %v1490_v35, %v1872_v57 }
 0x29e   : > { %v1875_v4 = vmul.f32 %v1873_v37, %v1873_v37 }
 0x2a0   : > { %v1876_v31 = vadd.f32 %v1875_v4, %v1874_v38 }
 0x2a2   : > { %v1878_v39 = vsel %vm1877_vm8, %v1876_v31, 0.0 }
 0x2a3   : > { %1879 = vadd.xlane.f32.xlu1 %v1878_v39 }
 0x316   : > { %v1880_v42 = vpop.xlane.xlu1 %1879 }
 0x317   : > { %v1881_v43 = vrot.slane %v1880_v42, 4 }
 0x319   : > { %v1882_v44 = vadd.f32 %v1881_v43, %v1880_v42 }
 0x31b   : > { %v1883_v45 = vrot.slane %v1882_v44, 2 }
 0x31d   : > { %v1884_v46 = vadd.f32 %v1883_v45, %v1882_v44 }
 0x31f   : > { %v1885_v16 = vrot.slane %v1884_v46, 1 }
 0x321   : > { %v1886_v18 = vadd.f32 %v1885_v16, %v1884_v46 }
 0x323   : > { %1994 = vpush %v1886_v18 }
 0x354   : > { %s1995_s30 = spop %1994 }
 0x355   : > { %v1888_v61 = vstv %s1995_s30 }
 0x356   : > { %1890 = vst.msk [vmem:[%s230_s10] sm:$0x1] %vm1889_vm9, %v1888_v61 }
 0x357 PF: > { %p16_p8 = scmp.ge.s32.totalorder %s2192_s17, 4   ;;  %s2648_s12 = smov %s2135_s13 }
 0x358   : > { %s2649_s13 = smov %s2139_s14  ;;  %s2650_s14 = smov %s2202_s20 }
 0x359   : > { %s2651_s15 = smov %s2192_s17  ;;  %18 = sbr.rel (!%p16_p8) target bundleno = 5 (0x5), region = 89 }
 0x35e   :  { %1908 = vsyncpa [#allocation3], 1 }
 0x35f   :  { %1910 = vsyncpa [#allocation3 + $0x1], 1 }
 0x360   :  { %1911 = vsyncpa [#allocation5], 1 }
 0x361   :  { %1913 = vsyncpa [#allocation5 + $0x1], 1 }

</bundles_post_ra>
